<compile_context>
chip_gen: v7x
topology: tpu7x:2x2x1
jax: 0.10.0
libtpu: 0.0.40
codegen_flags: <defaults>
</compile_context>

<pallas_src>
import functools

import numpy as np
import jax
import jax.numpy as jnp
from jax.experimental import pallas as pl
from jax.experimental.pallas import tpu as pltpu


_VMEM_LIMIT = 32 * 1024 * 1024   # explicit budget; safe on v5e/v6e/v7x


# ------------------------------ helpers -------------------------------------

def _round_up(x, m):
    return ((x + m - 1) // m) * m


def _pad_to(a, shape):
    pads = tuple((0, t - s) for s, t in zip(a.shape, shape))
    if all(p == (0, 0) for p in pads):
        return a
    return jnp.pad(a, pads)


def _pick_tile(dim, quantum, pref):
    """Largest multiple of `quantum` that divides `dim` and is <= pref."""
    assert dim % quantum == 0, (dim, quantum)
    t = min(pref, dim)
    t -= t % quantum
    if t == 0:
        t = quantum
    while dim % t != 0:
        t -= quantum
    return t


# --------------------------- tiled linear kernel -----------------------------
# y = act(x @ w + b); x f32 (M,K), w bf16 (K,N) pre-padded, b f32 (1,N).
# The f32 output block itself is the accumulator (no extra VMEM scratch).

def _linear_kernel(x_ref, w_ref, b_ref, o_ref, *, activation, nk):
    k = pl.program_id(2)

    @pl.when(k == 0)
    def _():
        o_ref[...] = jnp.zeros_like(o_ref)

    o_ref[...] += jnp.dot(x_ref[...].astype(jnp.bfloat16),
                          w_ref[...].astype(jnp.bfloat16),
                          preferred_element_type=jnp.float32)

    @pl.when(k == nk - 1)
    def _():
        y = o_ref[...] + b_ref[...]
        if activation == "relu":
            y = jnp.maximum(y, 0.0)
        o_ref[...] = y


def linear(x, w, b, activation=None, *, tm=256, tn=256, tk=512):
    M, K = x.shape
    Kw, N = w.shape
    assert Kw == K
    tm = _pick_tile(M, 8, tm)
    tn = _pick_tile(N, 128, tn)
    tk = _pick_tile(K, 128, tk)
    nk = K // tk
    return pl.pallas_call(
        functools.partial(_linear_kernel, activation=activation, nk=nk),
        grid=(M // tm, N // tn, nk),
        in_specs=[
            pl.BlockSpec((tm, tk), lambda i, j, k: (i, k)),
            pl.BlockSpec((tk, tn), lambda i, j, k: (k, j)),
            pl.BlockSpec((1, tn), lambda i, j, k: (0, j)),
        ],
        out_specs=pl.BlockSpec((tm, tn), lambda i, j, k: (i, j)),
        out_shape=jax.ShapeDtypeStruct((M, N), x.dtype),
        compiler_params=pltpu.CompilerParams(
            dimension_semantics=("parallel", "parallel", "arbitrary"),
            vmem_limit_bytes=_VMEM_LIMIT),
    )(x, w, b)


# ---------------- fused linear + residual add + LayerNorm kernel -------------
# LayerNorm((x @ w + b) + resid).  Model dim is lane-padded to D; statistics
# are computed over the real width d_real (padded lanes of y are zero by
# construction, gamma/beta are zero-padded so padded output lanes stay zero).

def _linear_add_ln_kernel(x_ref, w_ref, b_ref, r_ref, g_ref, bt_ref, o_ref, *,
                          eps, nk, d_real):
    k = pl.program_id(1)

    @pl.when(k == 0)
    def _():
        o_ref[...] = jnp.zeros_like(o_ref)

    o_ref[...] += jnp.dot(x_ref[...].astype(jnp.bfloat16),
                          w_ref[...].astype(jnp.bfloat16),
                          preferred_element_type=jnp.float32)

    @pl.when(k == nk - 1)
    def _():
        y = o_ref[...] + b_ref[...] + r_ref[...]
        inv_d = 1.0 / d_real
        mean = jnp.sum(y, axis=-1, keepdims=True) * inv_d
        var = jnp.maximum(
            jnp.sum(y * y, axis=-1, keepdims=True) * inv_d - mean * mean, 0.0)
        yn = (y - mean) * jax.lax.rsqrt(var + eps)
        o_ref[...] = yn * g_ref[...] + bt_ref[...]


def linear_add_layernorm(x, w, b, resid, gamma, beta, *, d_real, eps=1e-5,
                         tm=256, tk=512):
    M, K = x.shape
    Kw, D = w.shape
    assert Kw == K and resid.shape == (M, D)
    tm = _pick_tile(M, 8, tm)
    tk = _pick_tile(K, 128, tk)
    nk = K // tk
    return pl.pallas_call(
        functools.partial(_linear_add_ln_kernel, eps=eps, nk=nk, d_real=d_real),
        grid=(M // tm, nk),
        in_specs=[
            pl.BlockSpec((tm, tk), lambda i, k: (i, k)),
            pl.BlockSpec((tk, D), lambda i, k: (k, 0)),
            pl.BlockSpec((1, D), lambda i, k: (0, 0)),
            pl.BlockSpec((tm, D), lambda i, k: (i, 0)),
            pl.BlockSpec((1, D), lambda i, k: (0, 0)),
            pl.BlockSpec((1, D), lambda i, k: (0, 0)),
        ],
        out_specs=pl.BlockSpec((tm, D), lambda i, k: (i, 0)),
        out_shape=jax.ShapeDtypeStruct((M, D), x.dtype),
        compiler_params=pltpu.CompilerParams(
            dimension_semantics=("parallel", "arbitrary"),
            vmem_limit_bytes=_VMEM_LIMIT),
    )(x, w, b, resid, gamma, beta)


# ---------------------- fused in_proj + self-attention -----------------------
# x: (B, Sp, Dp) f32, w: (Dp, 3*Dp) bf16 with 128-lane-aligned Q|K|V sections,
# b: (1, 3*Dp) f32.  Grid = (batch, query-tiles).  K/V for a batch element are
# computed once (qi == 0) into a bf16 VMEM scratch; queries are tiled.
# Softmax normalization is applied after the PV matmul (post-PV scaling).
# TODO(synk): for very long sequences switch to flash-style K-tiling with an
#             online softmax instead of keeping full-S K/V resident in VMEM.

def _attn_kernel(x_ref, w_ref, b_ref, o_ref, kv_ref, *,
                 nheads, dh, d, scale, s_real, tq):
    Sp, Dp = x_ref.shape
    qi = pl.program_id(1)

    @pl.when(qi == 0)
    def _():
        kv = jnp.dot(x_ref[...].astype(jnp.bfloat16),
                     w_ref[:, Dp:].astype(jnp.bfloat16),
                     preferred_element_type=jnp.float32) + b_ref[:, Dp:]
        kv_ref[...] = kv.astype(kv_ref.dtype)

    start = pl.multiple_of(qi * tq, tq)
    xq = x_ref[pl.ds(start, tq), :]
    q = jnp.dot(xq.astype(jnp.bfloat16),
                w_ref[:, :Dp].astype(jnp.bfloat16),
                preferred_element_type=jnp.float32) + b_ref[:, :Dp]
    q = q * scale                                   # fold scale into Q once

    outs = []
    for h in range(nheads):
        qh = q[:, h * dh:(h + 1) * dh].astype(jnp.bfloat16)
        kh = kv_ref[:, h * dh:(h + 1) * dh]               # (Sp, dh) bf16
        vh = kv_ref[:, Dp + h * dh:Dp + (h + 1) * dh]     # (Sp, dh) bf16
        # contract last dims -> no materialized k.T / XLU transpose
        s = jax.lax.dot_general(qh, kh, (((1,), (1,)), ((), ())),
                                preferred_element_type=jnp.float32)
        if Sp != s_real:                                  # mask padded keys
            kid = jax.lax.broadcasted_iota(jnp.int32, s.shape, 1)
            s = jnp.where(kid < s_real, s, -jnp.inf)
        m = jnp.max(s, axis=-1, keepdims=True)
        p = jnp.exp(s - m)
        l = jnp.sum(p, axis=-1, keepdims=True)
        pv = jnp.dot(p.astype(jnp.bfloat16), vh,
                     preferred_element_type=jnp.float32)
        # post-PV normalization: O(tq*dh) scaling instead of O(tq*Sp)
        outs.append(pv * pl.reciprocal(l, approx=True))

    out = jnp.concatenate(outs, axis=-1)            # single lane-dense store
    if Dp > d:
        out = jnp.concatenate(
            [out, jnp.zeros((out.shape[0], Dp - d), out.dtype)], axis=-1)
    o_ref[...] = out.astype(o_ref.dtype)


def attention_block(x, w, b, *, nheads, d, s_real, tq=512):
    B, Sp, Dp = x.shape
    dh = d // nheads
    scale = 1.0 / float(np.sqrt(dh))
    tq = _pick_tile(Sp, 8, min(tq, Sp))
    nq = Sp // tq
    return pl.pallas_call(
        functools.partial(_attn_kernel, nheads=nheads, dh=dh, d=d,
                          scale=scale, s_real=s_real, tq=tq),
        grid=(B, nq),
        in_specs=[
            pl.BlockSpec((None, Sp, Dp), lambda bi, qi: (bi, 0, 0)),
            pl.BlockSpec((Dp, 3 * Dp), lambda bi, qi: (0, 0)),
            pl.BlockSpec((1, 3 * Dp), lambda bi, qi: (0, 0)),
        ],
        out_specs=pl.BlockSpec((None, tq, Dp), lambda bi, qi: (bi, qi, 0)),
        out_shape=jax.ShapeDtypeStruct((B, Sp, Dp), x.dtype),
        scratch_shapes=[pltpu.VMEM((Sp, 2 * Dp), jnp.bfloat16)],
        compiler_params=pltpu.CompilerParams(
            dimension_semantics=("parallel", "arbitrary"),
            vmem_limit_bytes=_VMEM_LIMIT),
    )(x, w, b)


# --------------------------- fused 3-layer MLP head ---------------------------

def _mlp_head_kernel(x_ref, w0, b0, w1, b1, w2, b2, o_ref):
    h = jnp.dot(x_ref[...].astype(jnp.bfloat16), w0[...].astype(jnp.bfloat16),
                preferred_element_type=jnp.float32) + b0[...]
    h = jnp.maximum(h, 0.0)
    h = jnp.dot(h.astype(jnp.bfloat16), w1[...].astype(jnp.bfloat16),
                preferred_element_type=jnp.float32) + b1[...]
    h = jnp.maximum(h, 0.0)
    h = jnp.dot(h.astype(jnp.bfloat16), w2[...].astype(jnp.bfloat16),
                preferred_element_type=jnp.float32) + b2[...]
    o_ref[...] = h.astype(o_ref.dtype)


def mlp_head(x, w0, b0, w1, b1, w2, b2, *, tm=256):
    M, Dp = x.shape
    H0p, H1p, OUTp = w0.shape[1], w1.shape[1], w2.shape[1]
    weight_bytes = 2 * (Dp * H0p + H0p * H1p + H1p * OUTp)
    if weight_bytes > 8 * 1024 * 1024:
        # weights too large to keep fully resident -> fall back to tiled linears
        h = linear(x, w0, b0, activation="relu")
        h = linear(h, w1, b1, activation="relu")
        return linear(h, w2, b2)
    tm = _pick_tile(M, 8, tm)
    return pl.pallas_call(
        _mlp_head_kernel,
        grid=(M // tm,),
        in_specs=[
            pl.BlockSpec((tm, Dp), lambda i: (i, 0)),
            pl.BlockSpec((Dp, H0p), lambda i: (0, 0)),
            pl.BlockSpec((1, H0p), lambda i: (0, 0)),
            pl.BlockSpec((H0p, H1p), lambda i: (0, 0)),
            pl.BlockSpec((1, H1p), lambda i: (0, 0)),
            pl.BlockSpec((H1p, OUTp), lambda i: (0, 0)),
            pl.BlockSpec((1, OUTp), lambda i: (0, 0)),
        ],
        out_specs=pl.BlockSpec((tm, OUTp), lambda i: (i, 0)),
        out_shape=jax.ShapeDtypeStruct((M, OUTp), x.dtype),
        compiler_params=pltpu.CompilerParams(
            dimension_semantics=("parallel",),
            vmem_limit_bytes=_VMEM_LIMIT),
    )(x, w0, b0, w1, b1, w2, b2)


# ------------------------------ Model (glue) ---------------------------------

def get_sinusoid_encoding_table(n_position, d_model):
    pos = np.arange(n_position, dtype=np.float64)[:, None]
    hid = np.arange(d_model)[None, :]
    table = pos / np.power(10000.0, 2.0 * (hid // 2) / d_model)
    table[:, 0::2] = np.sin(table[:, 0::2])
    table[:, 1::2] = np.cos(table[:, 1::2])
    return table.astype(np.float32)


def init_params(key, cfg):
    """All weights pre-padded to 128-lane multiples and pre-cast to bf16 once,
    so the per-call hot path never pads/slices/casts parameters."""
    d = cfg["inc"]
    Din = cfg["input_dim"]
    ff = cfg["feedforward_dim"]
    H0, H1 = cfg["head_dims"]
    out_dim = cfg["out_dim"]

    Dp, Dinp, FFp = _round_up(d, 128), _round_up(Din, 128), _round_up(ff, 128)
    H0p, H1p, OUTp = (_round_up(v, 128) for v in (H0, H1, out_dim))

    keys = iter(jax.random.split(key, 16 + 8 * cfg["nlayers"]))

    def dense(rows, cols, rows_p, cols_p, scale=0.05):
        w = jax.random.normal(next(keys), (rows, cols), jnp.float32) * scale
        return _pad_to(w, (rows_p, cols_p)).astype(jnp.bfloat16)

    pe = np.zeros((cfg["seq_len"], Dp), np.float32)
    pe[:, :d] = get_sinusoid_encoding_table(cfg["seq_len"], d)

    # LN gamma/beta zero-padded beyond d so padded lanes of the residual
    # stream stay exactly zero after every LayerNorm.
    ln_g = jnp.pad(jnp.ones((1, d), jnp.float32), ((0, 0), (0, Dp - d)))
    ln_b = jnp.zeros((1, Dp), jnp.float32)

    params = {
        "affine_w": dense(Din, d, Dinp, Dp),
        "affine_b": jnp.zeros((1, Dp), jnp.float32),
        "pe_table": jnp.asarray(pe),
        "layers": [],
        "head0_w": dense(d, H0, Dp, H0p), "head0_b": jnp.zeros((1, H0p), jnp.float32),
        "head1_w": dense(H0, H1, H0p, H1p), "head1_b": jnp.zeros((1, H1p), jnp.float32),
        "head2_w": dense(H1, out_dim, H1p, OUTp), "head2_b": jnp.zeros((1, OUTp), jnp.float32),
    }

    for _ in range(cfg["nlayers"]):
        # Q|K|V column sections each padded to Dp -> 128-lane-aligned sections.
        wq = dense(d, d, Dp, Dp)
        wk = dense(d, d, Dp, Dp)
        wv = dense(d, d, Dp, Dp)
        params["layers"].append({
            "in_proj_w": jnp.concatenate([wq, wk, wv], axis=1),   # (Dp, 3*Dp)
            "in_proj_b": jnp.zeros((1, 3 * Dp), jnp.float32),
            "out_proj_w": dense(d, d, Dp, Dp),
            "out_proj_b": jnp.zeros((1, Dp), jnp.float32),
            "ff1_w": dense(d, ff, Dp, FFp), "ff1_b": jnp.zeros((1, FFp), jnp.float32),
            "ff2_w": dense(ff, d, FFp, Dp), "ff2_b": jnp.zeros((1, Dp), jnp.float32),
            "ln1_g": ln_g, "ln1_b": ln_b,
            "ln2_g": ln_g, "ln2_b": ln_b,
        })
    return params


def bert_forward(params, cfg, x):
    """x: (S, B, input_dim) -> (S, B, out_dim).  Inference (dropout = id)."""
    S, B, Din = x.shape
    d = cfg["inc"]
    H = cfg["nheads"]
    Dp = _round_up(d, 128)
    Dinp = _round_up(Din, 128)
    Sp = _round_up(S, 8)

    # single pad into the internal batch-major, 128-lane-padded layout
    xb = jnp.transpose(x, (1, 0, 2))                              # (B, S, Din)
    xb = jnp.pad(xb, ((0, 0), (0, Sp - S), (0, Dinp - Din)))
    xf = xb.reshape(B * Sp, Dinp)

    xf = linear(xf, params["affine_w"], params["affine_b"])       # (B*Sp, Dp)

    if cfg["use_pe"]:
        pe = params["pe_table"][:S]
        if Sp != S:
            pe = jnp.pad(pe, ((0, Sp - S), (0, 0)))
        xf = (xf.reshape(B, Sp, Dp) + pe[None]).reshape(B * Sp, Dp)

    for layer in params["layers"]:
        # --- self-attention block (post-norm, PyTorch default) ---
        ao = attention_block(xf.reshape(B, Sp, Dp),
                             layer["in_proj_w"], layer["in_proj_b"],
                             nheads=H, d=d, s_real=S).reshape(B * Sp, Dp)
        xf = linear_add_layernorm(ao, layer["out_proj_w"], layer["out_proj_b"],
                                  xf, layer["ln1_g"], layer["ln1_b"], d_real=d)

        # --- feed-forward block (ReLU, PyTorch default activation) ---
        hff = linear(xf, layer["ff1_w"], layer["ff1_b"], activation="relu")
        xf = linear_add_layernorm(hff, layer["ff2_w"], layer["ff2_b"],
                                  xf, layer["ln2_g"], layer["ln2_b"], d_real=d)

    # --- Regressor head: Linear-ReLU-Linear-ReLU-Linear, no tanh (fused) ---
    h = mlp_head(xf, params["head0_w"], params["head0_b"],
                 params["head1_w"], params["head1_b"],
                 params["head2_w"], params["head2_b"])
    out = h.reshape(B, Sp, -1)[:, :S, :cfg["out_dim"]]
    return jnp.transpose(out, (1, 0, 2))


# --------------------------------- main --------------------------------------

if __name__ == "__main__":
    cfg = dict(
        input_dim=16,
        affine_dim=32,
        inc=32,                 # d_model after affine
        nheads=4,
        nlayers=2,
        feedforward_dim=64,
        head_dims=[64, 32],
        out_dim=4,
        use_pe=True,
        seq_len=8,
    )
    key = jax.random.PRNGKey(0)
    k_params, k_x = jax.random.split(key)
    params = init_params(k_params, cfg)

    S, B = cfg["seq_len"], 2
    x = jax.random.normal(k_x, (S, B, cfg["input_dim"]), dtype=jnp.float32)

    fwd = jax.jit(lambda inp: bert_forward(params, cfg, inp))
    out = fwd(x)
    jax.block_until_ready(out)

    assert out.shape == (S, B, cfg["out_dim"]), out.shape
    assert out.dtype == jnp.float32
    assert bool(jnp.all(jnp.isfinite(out)))
    print("KERNEL_OK")
</pallas_src>

<mosaic_0001>
module attributes {stable_mosaic.version = 11 : i64} {
  func.func @_linear_kernel(%arg0: i32, %arg1: i32, %arg2: i32, %arg3: memref<16x128xf32, #tpu.memory_space<vmem>>, %arg4: memref<128x128xbf16, #tpu.memory_space<vmem>>, %arg5: memref<1x128xf32, #tpu.memory_space<vmem>>, %arg6: memref<16x128xf32, #tpu.memory_space<vmem>>) attributes {dimension_semantics = [#tpu.dimension_semantics<parallel>, #tpu.dimension_semantics<parallel>, #tpu.dimension_semantics<arbitrary>], iteration_bounds = array<i64: 1, 1, 1>, scalar_prefetch = 0 : i64, scratch_operands = 0 : i64, tpu.core_type = #tpu.core_type<tc>, window_params = [{transform_indices = @transform_0, window_bounds = array<i64: 16, 128>}, {transform_indices = @transform_1, window_bounds = array<i64: 128, 128>}, {transform_indices = @transform_2, window_bounds = array<i64: 1, 128>}, {transform_indices = @transform_3, window_bounds = array<i64: 16, 128>}]} {
    %c0_i32 = arith.constant 0 : i32
    %0 = arith.cmpi eq, %arg2, %c0_i32 : i32
    %1 = arith.extui %0 : i1 to i32
    %c0_i32_0 = arith.constant 0 : i32
    %2 = arith.cmpi ne, %1, %c0_i32_0 : i32
    scf.if %2 {
      %cst_10 = arith.constant 0.000000e+00 : f32
      %13 = vector.broadcast %cst_10 : f32 to vector<16x128xf32>
      %c0_11 = arith.constant 0 : index
      %c0_12 = arith.constant 0 : index
      %14 = vector.load %arg6[%c0_11, %c0_12] : memref<16x128xf32, #tpu.memory_space<vmem>>, vector<16x128xf32>
      tpu.vector_store %arg6[%c0_11, %c0_12], %13 {strides = array<i32>} : memref<16x128xf32, #tpu.memory_space<vmem>>, vector<16x128xf32>,
    } else {
    }
    %c0 = arith.constant 0 : index
    %c0_1 = arith.constant 0 : index
    %3 = vector.load %arg6[%c0, %c0_1] : memref<16x128xf32, #tpu.memory_space<vmem>>, vector<16x128xf32>
    %c0_2 = arith.constant 0 : index
    %c0_3 = arith.constant 0 : index
    %4 = vector.load %arg3[%c0_2, %c0_3] : memref<16x128xf32, #tpu.memory_space<vmem>>, vector<16x128xf32>
    %5 = arith.truncf %4 : vector<16x128xf32> to vector<16x128xbf16>
    %c0_4 = arith.constant 0 : index
    %c0_5 = arith.constant 0 : index
    %6 = vector.load %arg4[%c0_4, %c0_5] : memref<128x128xbf16, #tpu.memory_space<vmem>>, vector<128x128xbf16>
    %cst = arith.constant dense<0.000000e+00> : vector<16x128xf32>
    %7 = tpu.matmul %5, %6, %cst {dimension_numbers = #tpu.dot_dimension_numbers<[1], [0], [0], [1], [0, 0, 1, 1], [], []>} : vector<16x128xbf16>, vector<128x128xbf16>, vector<16x128xf32> -> vector<16x128xf32>
    %8 = arith.addf %3, %7 : vector<16x128xf32>
    %c0_6 = arith.constant 0 : index
    %c0_7 = arith.constant 0 : index
    %9 = vector.load %arg6[%c0_6, %c0_7] : memref<16x128xf32, #tpu.memory_space<vmem>>, vector<16x128xf32>
    tpu.vector_store %arg6[%c0_6, %c0_7], %8 {strides = array<i32>} : memref<16x128xf32, #tpu.memory_space<vmem>>, vector<16x128xf32>,
    %c0_i32_8 = arith.constant 0 : i32
    %10 = arith.cmpi eq, %arg2, %c0_i32_8 : i32
    %11 = arith.extui %10 : i1 to i32
    %c0_i32_9 = arith.constant 0 : i32
    %12 = arith.cmpi ne, %11, %c0_i32_9 : i32
    scf.if %12 {
      %c0_10 = arith.constant 0 : index
      %c0_11 = arith.constant 0 : index
      %13 = vector.load %arg6[%c0_10, %c0_11] : memref<16x128xf32, #tpu.memory_space<vmem>>, vector<16x128xf32>
      %c0_12 = arith.constant 0 : index
      %c0_13 = arith.constant 0 : index
      %14 = vector.load %arg5[%c0_12, %c0_13] : memref<1x128xf32, #tpu.memory_space<vmem>>, vector<1x128xf32>
      %15 = vector.broadcast %14 : vector<1x128xf32> to vector<16x128xf32>
      %16 = arith.addf %13, %15 : vector<16x128xf32>
      %c0_14 = arith.constant 0 : index
      %c0_15 = arith.constant 0 : index
      %17 = vector.load %arg6[%c0_14, %c0_15] : memref<16x128xf32, #tpu.memory_space<vmem>>, vector<16x128xf32>
      tpu.vector_store %arg6[%c0_14, %c0_15], %16 {strides = array<i32>} : memref<16x128xf32, #tpu.memory_space<vmem>>, vector<16x128xf32>,
    } else {
    }
    return
  }
  func.func @transform_0(%arg0: i32, %arg1: i32, %arg2: i32) -> (i32, i32) {
    %c0_i32 = arith.constant 0 : i32
    return %arg0, %arg2 : i32, i32
  }
  func.func @transform_1(%arg0: i32, %arg1: i32, %arg2: i32) -> (i32, i32) {
    %c0_i32 = arith.constant 0 : i32
    return %arg2, %arg1 : i32, i32
  }
  func.func @transform_2(%arg0: i32, %arg1: i32, %arg2: i32) -> (i32, i32) {
    %c0_i32 = arith.constant 0 : i32
    %c0_i32_0 = arith.constant 0 : i32
    return %c0_i32, %arg1 : i32, i32
  }
  func.func @transform_3(%arg0: i32, %arg1: i32, %arg2: i32) -> (i32, i32) {
    %c0_i32 = arith.constant 0 : i32
    return %arg0, %arg1 : i32, i32
  }
}

module attributes {stable_mosaic.version = 11 : i64} {
  func.func @_attn_kernel(%arg0: i32, %arg1: i32, %arg2: memref<1x8x128xf32, #tpu.memory_space<vmem>>, %arg3: memref<128x384xbf16, #tpu.memory_space<vmem>>, %arg4: memref<1x384xf32, #tpu.memory_space<vmem>>, %arg5: memref<1x8x128xf32, #tpu.memory_space<vmem>>, %arg6: memref<8x256xbf16, #tpu.memory_space<vmem>>) attributes {dimension_semantics = [#tpu.dimension_semantics<parallel>, #tpu.dimension_semantics<arbitrary>], iteration_bounds = array<i64: 2, 1>, scalar_prefetch = 0 : i64, scratch_operands = 1 : i64, tpu.core_type = #tpu.core_type<tc>, window_params = [{transform_indices = @transform_0, window_bounds = array<i64: 1, 8, 128>}, {pipeline_mode = #tpu.pipeline_mode<synchronous>, transform_indices = @transform_1, window_bounds = array<i64: 128, 384>}, {pipeline_mode = #tpu.pipeline_mode<synchronous>, transform_indices = @transform_2, window_bounds = array<i64: 1, 384>}, {transform_indices = @transform_3, window_bounds = array<i64: 1, 8, 128>}]} {
    %c0_i32 = arith.constant 0 : i32
    %0 = arith.cmpi eq, %arg1, %c0_i32 : i32
    %1 = arith.extui %0 : i1 to i32
    %c0_i32_0 = arith.constant 0 : i32
    %2 = arith.cmpi ne, %1, %c0_i32_0 : i32
    scf.if %2 {
      %c0_36 = arith.constant 0 : index
      %c0_37 = arith.constant 0 : index
      %c0_38 = arith.constant 0 : index
      %90 = vector.load %arg2[%c0_36, %c0_37, %c0_38] : memref<1x8x128xf32, #tpu.memory_space<vmem>>, vector<1x8x128xf32>
      %91 = vector.shape_cast %90 : vector<1x8x128xf32> to vector<8x128xf32>
      %92 = arith.truncf %91 : vector<8x128xf32> to vector<8x128xbf16>
      %c0_39 = arith.constant 0 : index
      %c128_40 = arith.constant 128 : index
      %93 = vector.load %arg3[%c0_39, %c128_40] : memref<128x384xbf16, #tpu.memory_space<vmem>>, vector<128x256xbf16>
      %cst_41 = arith.constant dense<0.000000e+00> : vector<8x256xf32>
      %94 = tpu.matmul %92, %93, %cst_41 {dimension_numbers = #tpu.dot_dimension_numbers<[1], [0], [0], [1], [0, 0, 1, 1], [], []>} : vector<8x128xbf16>, vector<128x256xbf16>, vector<8x256xf32> -> vector<8x256xf32>
      %c0_42 = arith.constant 0 : index
      %c128_43 = arith.constant 128 : index
      %95 = vector.load %arg4[%c0_42, %c128_43] : memref<1x384xf32, #tpu.memory_space<vmem>>, vector<1x256xf32>
      %96 = vector.broadcast %95 : vector<1x256xf32> to vector<8x256xf32>
      %97 = arith.addf %94, %96 : vector<8x256xf32>
      %98 = arith.truncf %97 : vector<8x256xf32> to vector<8x256xbf16>
      %c0_44 = arith.constant 0 : index
      %c0_45 = arith.constant 0 : index
      %99 = vector.load %arg6[%c0_44, %c0_45] : memref<8x256xbf16, #tpu.memory_space<vmem>>, vector<8x256xbf16>
      tpu.vector_store %arg6[%c0_44, %c0_45], %98 {strides = array<i32>} : memref<8x256xbf16, #tpu.memory_space<vmem>>, vector<8x256xbf16>,
    } else {
    }
    %c8_i32 = arith.constant 8 : i32
    %3 = arith.muli %arg1, %c8_i32 : i32
    %4 = tpu.assume_multiple %3, 8 : i32
    %c0 = arith.constant 0 : index
    %5 = arith.index_cast %4 : i32 to index
    %c0_1 = arith.constant 0 : index
    %6 = vector.load %arg2[%c0, %5, %c0_1] : memref<1x8x128xf32, #tpu.memory_space<vmem>>, vector<1x8x128xf32>
    %7 = vector.shape_cast %6 : vector<1x8x128xf32> to vector<8x128xf32>
    %8 = arith.truncf %7 : vector<8x128xf32> to vector<8x128xbf16>
    %c0_2 = arith.constant 0 : index
    %c0_3 = arith.constant 0 : index
    %9 = vector.load %arg3[%c0_2, %c0_3] : memref<128x384xbf16, #tpu.memory_space<vmem>>, vector<128x128xbf16>
    %cst = arith.constant dense<0.000000e+00> : vector<8x128xf32>
    %10 = tpu.matmul %8, %9, %cst {dimension_numbers = #tpu.dot_dimension_numbers<[1], [0], [0], [1], [0, 0, 1, 1], [], []>} : vector<8x128xbf16>, vector<128x128xbf16>, vector<8x128xf32> -> vector<8x128xf32>
    %c0_4 = arith.constant 0 : index
    %c0_5 = arith.constant 0 : index
    %11 = vector.load %arg4[%c0_4, %c0_5] : memref<1x384xf32, #tpu.memory_space<vmem>>, vector<1x128xf32>
    %12 = vector.broadcast %11 : vector<1x128xf32> to vector<8x128xf32>
    %13 = arith.addf %10, %12 : vector<8x128xf32>
    %cst_6 = arith.constant 0.353553385 : f32
    %14 = vector.broadcast %cst_6 : f32 to vector<8x128xf32>
    %15 = arith.mulf %13, %14 : vector<8x128xf32>
    %16 = vector.extract_strided_slice %15 {offsets = [0, 0], sizes = [8, 8], strides = [1, 1]} : vector<8x128xf32> to vector<8x8xf32>
    %17 = arith.truncf %16 : vector<8x8xf32> to vector<8x8xbf16>
    %c0_7 = arith.constant 0 : index
    %c0_8 = arith.constant 0 : index
    %18 = vector.load %arg6[%c0_7, %c0_8] : memref<8x256xbf16, #tpu.memory_space<vmem>>, vector<8x8xbf16>
    %c0_9 = arith.constant 0 : index
    %c128 = arith.constant 128 : index
    %19 = vector.load %arg6[%c0_9, %c128] : memref<8x256xbf16, #tpu.memory_space<vmem>>, vector<8x8xbf16>
    %cst_10 = arith.constant dense<0.000000e+00> : vector<8x8xf32>
    %20 = tpu.matmul %17, %18, %cst_10 {dimension_numbers = #tpu.dot_dimension_numbers<[1], [1], [0], [0], [0, 0, 1, 0], [], []>} : vector<8x8xbf16>, vector<8x8xbf16>, vector<8x8xf32> -> vector<8x8xf32>
    %cst_11 = arith.constant dense<0xFF800000> : vector<8xf32>
    %21 = vector.multi_reduction <maximumf>, %20, %cst_11 [1] : vector<8x8xf32> to vector<8xf32>
    %22 = vector.shape_cast %21 : vector<8xf32> to vector<8x1xf32>
    %23 = vector.broadcast %22 : vector<8x1xf32> to vector<8x8xf32>
    %24 = arith.subf %20, %23 : vector<8x8xf32>
    %25 = math.exp %24 : vector<8x8xf32>
    %cst_12 = arith.constant dense<0.000000e+00> : vector<8xf32>
    %26 = vector.multi_reduction <add>, %25, %cst_12 [1] : vector<8x8xf32> to vector<8xf32>
    %27 = vector.shape_cast %26 : vector<8xf32> to vector<8x1xf32>
    %28 = arith.truncf %25 : vector<8x8xf32> to vector<8x8xbf16>
    %cst_13 = arith.constant dense<0.000000e+00> : vector<8x8xf32>
    %29 = tpu.matmul %28, %19, %cst_13 {dimension_numbers = #tpu.dot_dimension_numbers<[1], [0], [0], [1], [0, 0, 1, 1], [], []>} : vector<8x8xbf16>, vector<8x8xbf16>, vector<8x8xf32> -> vector<8x8xf32>
    %30 = tpu.reciprocal %27 {approx = true} : vector<8x1xf32> -> vector<8x1xf32>
    %31 = vector.broadcast %30 : vector<8x1xf32> to vector<8x8xf32>
    %32 = arith.mulf %29, %31 : vector<8x8xf32>
    %33 = vector.extract_strided_slice %15 {offsets = [0, 8], sizes = [8, 8], strides = [1, 1]} : vector<8x128xf32> to vector<8x8xf32>
    %34 = arith.truncf %33 : vector<8x8xf32> to vector<8x8xbf16>
    %c0_14 = arith.constant 0 : index
    %c8 = arith.constant 8 : index
    %35 = vector.load %arg6[%c0_14, %c8] : memref<8x256xbf16, #tpu.memory_space<vmem>>, vector<8x8xbf16>
    %c0_15 = arith.constant 0 : index
    %c136 = arith.constant 136 : index
    %36 = vector.load %arg6[%c0_15, %c136] : memref<8x256xbf16, #tpu.memory_space<vmem>>, vector<8x8xbf16>
    %cst_16 = arith.constant dense<0.000000e+00> : vector<8x8xf32>
    %37 = tpu.matmul %34, %35, %cst_16 {dimension_numbers = #tpu.dot_dimension_numbers<[1], [1], [0], [0], [0, 0, 1, 0], [], []>} : vector<8x8xbf16>, vector<8x8xbf16>, vector<8x8xf32> -> vector<8x8xf32>
    %cst_17 = arith.constant dense<0xFF800000> : vector<8xf32>
    %38 = vector.multi_reduction <maximumf>, %37, %cst_17 [1] : vector<8x8xf32> to vector<8xf32>
    %39 = vector.shape_cast %38 : vector<8xf32> to vector<8x1xf32>
    %40 = vector.broadcast %39 : vector<8x1xf32> to vector<8x8xf32>
    %41 = arith.subf %37, %40 : vector<8x8xf32>
    %42 = math.exp %41 : vector<8x8xf32>
    %cst_18 = arith.constant dense<0.000000e+00> : vector<8xf32>
    %43 = vector.multi_reduction <add>, %42, %cst_18 [1] : vector<8x8xf32> to vector<8xf32>
    %44 = vector.shape_cast %43 : vector<8xf32> to vector<8x1xf32>
    %45 = arith.truncf %42 : vector<8x8xf32> to vector<8x8xbf16>
    %cst_19 = arith.constant dense<0.000000e+00> : vector<8x8xf32>
    %46 = tpu.matmul %45, %36, %cst_19 {dimension_numbers = #tpu.dot_dimension_numbers<[1], [0], [0], [1], [0, 0, 1, 1], [], []>} : vector<8x8xbf16>, vector<8x8xbf16>, vector<8x8xf32> -> vector<8x8xf32>
    %47 = tpu.reciprocal %44 {approx = true} : vector<8x1xf32> -> vector<8x1xf32>
    %48 = vector.broadcast %47 : vector<8x1xf32> to vector<8x8xf32>
    %49 = arith.mulf %46, %48 : vector<8x8xf32>
    %50 = vector.extract_strided_slice %15 {offsets = [0, 16], sizes = [8, 8], strides = [1, 1]} : vector<8x128xf32> to vector<8x8xf32>
    %51 = arith.truncf %50 : vector<8x8xf32> to vector<8x8xbf16>
    %c0_20 = arith.constant 0 : index
    %c16 = arith.constant 16 : index
    %52 = vector.load %arg6[%c0_20, %c16] : memref<8x256xbf16, #tpu.memory_space<vmem>>, vector<8x8xbf16>
    %c0_21 = arith.constant 0 : index
    %c144 = arith.constant 144 : index
    %53 = vector.load %arg6[%c0_21, %c144] : memref<8x256xbf16, #tpu.memory_space<vmem>>, vector<8x8xbf16>
    %cst_22 = arith.constant dense<0.000000e+00> : vector<8x8xf32>
    %54 = tpu.matmul %51, %52, %cst_22 {dimension_numbers = #tpu.dot_dimension_numbers<[1], [1], [0], [0], [0, 0, 1, 0], [], []>} : vector<8x8xbf16>, vector<8x8xbf16>, vector<8x8xf32> -> vector<8x8xf32>
    %cst_23 = arith.constant dense<0xFF800000> : vector<8xf32>
    %55 = vector.multi_reduction <maximumf>, %54, %cst_23 [1] : vector<8x8xf32> to vector<8xf32>
    %56 = vector.shape_cast %55 : vector<8xf32> to vector<8x1xf32>
    %57 = vector.broadcast %56 : vector<8x1xf32> to vector<8x8xf32>
    %58 = arith.subf %54, %57 : vector<8x8xf32>
    %59 = math.exp %58 : vector<8x8xf32>
    %cst_24 = arith.constant dense<0.000000e+00> : vector<8xf32>
    %60 = vector.multi_reduction <add>, %59, %cst_24 [1] : vector<8x8xf32> to vector<8xf32>
    %61 = vector.shape_cast %60 : vector<8xf32> to vector<8x1xf32>
    %62 = arith.truncf %59 : vector<8x8xf32> to vector<8x8xbf16>
    %cst_25 = arith.constant dense<0.000000e+00> : vector<8x8xf32>
    %63 = tpu.matmul %62, %53, %cst_25 {dimension_numbers = #tpu.dot_dimension_numbers<[1], [0], [0], [1], [0, 0, 1, 1], [], []>} : vector<8x8xbf16>, vector<8x8xbf16>, vector<8x8xf32> -> vector<8x8xf32>
    %64 = tpu.reciprocal %61 {approx = true} : vector<8x1xf32> -> vector<8x1xf32>
    %65 = vector.broadcast %64 : vector<8x1xf32> to vector<8x8xf32>
    %66 = arith.mulf %63, %65 : vector<8x8xf32>
    %67 = vector.extract_strided_slice %15 {offsets = [0, 24], sizes = [8, 8], strides = [1, 1]} : vector<8x128xf32> to vector<8x8xf32>
    %68 = arith.truncf %67 : vector<8x8xf32> to vector<8x8xbf16>
    %c0_26 = arith.constant 0 : index
    %c24 = arith.constant 24 : index
    %69 = vector.load %arg6[%c0_26, %c24] : memref<8x256xbf16, #tpu.memory_space<vmem>>, vector<8x8xbf16>
    %c0_27 = arith.constant 0 : index
    %c152 = arith.constant 152 : index
    %70 = vector.load %arg6[%c0_27, %c152] : memref<8x256xbf16, #tpu.memory_space<vmem>>, vector<8x8xbf16>
    %cst_28 = arith.constant dense<0.000000e+00> : vector<8x8xf32>
    %71 = tpu.matmul %68, %69, %cst_28 {dimension_numbers = #tpu.dot_dimension_numbers<[1], [1], [0], [0], [0, 0, 1, 0], [], []>} : vector<8x8xbf16>, vector<8x8xbf16>, vector<8x8xf32> -> vector<8x8xf32>
    %cst_29 = arith.constant dense<0xFF800000> : vector<8xf32>
    %72 = vector.multi_reduction <maximumf>, %71, %cst_29 [1] : vector<8x8xf32> to vector<8xf32>
    %73 = vector.shape_cast %72 : vector<8xf32> to vector<8x1xf32>
    %74 = vector.broadcast %73 : vector<8x1xf32> to vector<8x8xf32>
    %75 = arith.subf %71, %74 : vector<8x8xf32>
    %76 = math.exp %75 : vector<8x8xf32>
    %cst_30 = arith.constant dense<0.000000e+00> : vector<8xf32>
    %77 = vector.multi_reduction <add>, %76, %cst_30 [1] : vector<8x8xf32> to vector<8xf32>
    %78 = vector.shape_cast %77 : vector<8xf32> to vector<8x1xf32>
    %79 = arith.truncf %76 : vector<8x8xf32> to vector<8x8xbf16>
    %cst_31 = arith.constant dense<0.000000e+00> : vector<8x8xf32>
    %80 = tpu.matmul %79, %70, %cst_31 {dimension_numbers = #tpu.dot_dimension_numbers<[1], [0], [0], [1], [0, 0, 1, 1], [], []>} : vector<8x8xbf16>, vector<8x8xbf16>, vector<8x8xf32> -> vector<8x8xf32>
    %81 = tpu.reciprocal %78 {approx = true} : vector<8x1xf32> -> vector<8x1xf32>
    %82 = vector.broadcast %81 : vector<8x1xf32> to vector<8x8xf32>
    %83 = arith.mulf %80, %82 : vector<8x8xf32>
    %84 = tpu.concatenate %32, %49, %66, %83 in 1 : vector<8x8xf32>, vector<8x8xf32>, vector<8x8xf32>, vector<8x8xf32> -> vector<8x32xf32>
    %cst_32 = arith.constant 0.000000e+00 : f32
    %85 = vector.broadcast %cst_32 : f32 to vector<8x96xf32>
    %86 = tpu.concatenate %84, %85 in 1 : vector<8x32xf32>, vector<8x96xf32> -> vector<8x128xf32>
    %c0_33 = arith.constant 0 : index
    %c0_34 = arith.constant 0 : index
    %c0_35 = arith.constant 0 : index
    %87 = vector.load %arg5[%c0_33, %c0_34, %c0_35] : memref<1x8x128xf32, #tpu.memory_space<vmem>>, vector<1x8x128xf32>
    %88 = vector.shape_cast %87 : vector<1x8x128xf32> to vector<8x128xf32>
    %89 = vector.shape_cast %86 : vector<8x128xf32> to vector<1x8x128xf32>
    tpu.vector_store %arg5[%c0_33, %c0_34, %c0_35], %89 {strides = array<i32>} : memref<1x8x128xf32, #tpu.memory_space<vmem>>, vector<1x8x128xf32>,
    return
  }
  func.func @transform_0(%arg0: i32, %arg1: i32) -> (i32, i32, i32) {
    %c0_i32 = arith.constant 0 : i32
    %c0_i32_0 = arith.constant 0 : i32
    %c0_i32_1 = arith.constant 0 : i32
    return %arg0, %c0_i32, %c0_i32_0 : i32, i32, i32
  }
  func.func @transform_1(%arg0: i32, %arg1: i32) -> (i32, i32) {
    %c0_i32 = arith.constant 0 : i32
    %c0_i32_0 = arith.constant 0 : i32
    %c0_i32_1 = arith.constant 0 : i32
    return %c0_i32, %c0_i32_0 : i32, i32
  }
  func.func @transform_2(%arg0: i32, %arg1: i32) -> (i32, i32) {
    %c0_i32 = arith.constant 0 : i32
    %c0_i32_0 = arith.constant 0 : i32
    %c0_i32_1 = arith.constant 0 : i32
    return %c0_i32, %c0_i32_0 : i32, i32
  }
  func.func @transform_3(%arg0: i32, %arg1: i32) -> (i32, i32, i32) {
    %c0_i32 = arith.constant 0 : i32
    %c0_i32_0 = arith.constant 0 : i32
    return %arg0, %arg1, %c0_i32 : i32, i32, i32
  }
}

module attributes {stable_mosaic.version = 11 : i64} {
  func.func @_linear_add_ln_kernel(%arg0: i32, %arg1: i32, %arg2: memref<16x128xf32, #tpu.memory_space<vmem>>, %arg3: memref<128x128xbf16, #tpu.memory_space<vmem>>, %arg4: memref<1x128xf32, #tpu.memory_space<vmem>>, %arg5: memref<16x128xf32, #tpu.memory_space<vmem>>, %arg6: memref<1x128xf32, #tpu.memory_space<vmem>>, %arg7: memref<1x128xf32, #tpu.memory_space<vmem>>, %arg8: memref<16x128xf32, #tpu.memory_space<vmem>>) attributes {dimension_semantics = [#tpu.dimension_semantics<parallel>, #tpu.dimension_semantics<arbitrary>], iteration_bounds = array<i64: 1, 1>, scalar_prefetch = 0 : i64, scratch_operands = 0 : i64, tpu.core_type = #tpu.core_type<tc>, window_params = [{transform_indices = @transform_0, window_bounds = array<i64: 16, 128>}, {transform_indices = @transform_1, window_bounds = array<i64: 128, 128>}, {pipeline_mode = #tpu.pipeline_mode<synchronous>, transform_indices = @transform_2, window_bounds = array<i64: 1, 128>}, {transform_indices = @transform_3, window_bounds = array<i64: 16, 128>}, {pipeline_mode = #tpu.pipeline_mode<synchronous>, transform_indices = @transform_4, window_bounds = array<i64: 1, 128>}, {pipeline_mode = #tpu.pipeline_mode<synchronous>, transform_indices = @transform_5, window_bounds = array<i64: 1, 128>}, {transform_indices = @transform_6, window_bounds = array<i64: 16, 128>}]} {
    %c0_i32 = arith.constant 0 : i32
    %0 = arith.cmpi eq, %arg1, %c0_i32 : i32
    %1 = arith.extui %0 : i1 to i32
    %c0_i32_0 = arith.constant 0 : i32
    %2 = arith.cmpi ne, %1, %c0_i32_0 : i32
    scf.if %2 {
      %cst_10 = arith.constant 0.000000e+00 : f32
      %13 = vector.broadcast %cst_10 : f32 to vector<16x128xf32>
      %c0_11 = arith.constant 0 : index
      %c0_12 = arith.constant 0 : index
      %14 = vector.load %arg8[%c0_11, %c0_12] : memref<16x128xf32, #tpu.memory_space<vmem>>, vector<16x128xf32>
      tpu.vector_store %arg8[%c0_11, %c0_12], %13 {strides = array<i32>} : memref<16x128xf32, #tpu.memory_space<vmem>>, vector<16x128xf32>,
    } else {
    }
    %c0 = arith.constant 0 : index
    %c0_1 = arith.constant 0 : index
    %3 = vector.load %arg8[%c0, %c0_1] : memref<16x128xf32, #tpu.memory_space<vmem>>, vector<16x128xf32>
    %c0_2 = arith.constant 0 : index
    %c0_3 = arith.constant 0 : index
    %4 = vector.load %arg2[%c0_2, %c0_3] : memref<16x128xf32, #tpu.memory_space<vmem>>, vector<16x128xf32>
    %5 = arith.truncf %4 : vector<16x128xf32> to vector<16x128xbf16>
    %c0_4 = arith.constant 0 : index
    %c0_5 = arith.constant 0 : index
    %6 = vector.load %arg3[%c0_4, %c0_5] : memref<128x128xbf16, #tpu.memory_space<vmem>>, vector<128x128xbf16>
    %cst = arith.constant dense<0.000000e+00> : vector<16x128xf32>
    %7 = tpu.matmul %5, %6, %cst {dimension_numbers = #tpu.dot_dimension_numbers<[1], [0], [0], [1], [0, 0, 1, 1], [], []>} : vector<16x128xbf16>, vector<128x128xbf16>, vector<16x128xf32> -> vector<16x128xf32>
    %8 = arith.addf %3, %7 : vector<16x128xf32>
    %c0_6 = arith.constant 0 : index
    %c0_7 = arith.constant 0 : index
    %9 = vector.load %arg8[%c0_6, %c0_7] : memref<16x128xf32, #tpu.memory_space<vmem>>, vector<16x128xf32>
    tpu.vector_store %arg8[%c0_6, %c0_7], %8 {strides = array<i32>} : memref<16x128xf32, #tpu.memory_space<vmem>>, vector<16x128xf32>,
    %c0_i32_8 = arith.constant 0 : i32
    %10 = arith.cmpi eq, %arg1, %c0_i32_8 : i32
    %11 = arith.extui %10 : i1 to i32
    %c0_i32_9 = arith.constant 0 : i32
    %12 = arith.cmpi ne, %11, %c0_i32_9 : i32
    scf.if %12 {
      %c0_10 = arith.constant 0 : index
      %c0_11 = arith.constant 0 : index
      %13 = vector.load %arg8[%c0_10, %c0_11] : memref<16x128xf32, #tpu.memory_space<vmem>>, vector<16x128xf32>
      %c0_12 = arith.constant 0 : index
      %c0_13 = arith.constant 0 : index
      %14 = vector.load %arg4[%c0_12, %c0_13] : memref<1x128xf32, #tpu.memory_space<vmem>>, vector<1x128xf32>
      %15 = vector.broadcast %14 : vector<1x128xf32> to vector<16x128xf32>
      %16 = arith.addf %13, %15 : vector<16x128xf32>
      %c0_14 = arith.constant 0 : index
      %c0_15 = arith.constant 0 : index
      %17 = vector.load %arg5[%c0_14, %c0_15] : memref<16x128xf32, #tpu.memory_space<vmem>>, vector<16x128xf32>
      %18 = arith.addf %16, %17 : vector<16x128xf32>
      %cst_16 = arith.constant dense<0.000000e+00> : vector<16xf32>
      %19 = vector.multi_reduction <add>, %18, %cst_16 [1] : vector<16x128xf32> to vector<16xf32>
      %20 = vector.shape_cast %19 : vector<16xf32> to vector<16x1xf32>
      %cst_17 = arith.constant 3.125000e-02 : f32
      %21 = vector.broadcast %cst_17 : f32 to vector<16x1xf32>
      %22 = arith.mulf %20, %21 : vector<16x1xf32>
      %23 = arith.mulf %18, %18 : vector<16x128xf32>
      %cst_18 = arith.constant dense<0.000000e+00> : vector<16xf32>
      %24 = vector.multi_reduction <add>, %23, %cst_18 [1] : vector<16x128xf32> to vector<16xf32>
      %25 = vector.shape_cast %24 : vector<16xf32> to vector<16x1xf32>
      %cst_19 = arith.constant 3.125000e-02 : f32
      %26 = vector.broadcast %cst_19 : f32 to vector<16x1xf32>
      %27 = arith.mulf %25, %26 : vector<16x1xf32>
      %28 = arith.mulf %22, %22 : vector<16x1xf32>
      %29 = arith.subf %27, %28 : vector<16x1xf32>
      %cst_20 = arith.constant 0.000000e+00 : f32
      %30 = vector.broadcast %cst_20 : f32 to vector<16x1xf32>
      %31 = arith.maximumf %29, %30 : vector<16x1xf32>
      %32 = vector.broadcast %22 : vector<16x1xf32> to vector<16x128xf32>
      %33 = arith.subf %18, %32 : vector<16x128xf32>
      %cst_21 = arith.constant 9.99999974E-6 : f32
      %34 = vector.broadcast %cst_21 : f32 to vector<16x1xf32>
      %35 = arith.addf %31, %34 : vector<16x1xf32>
      %36 = math.rsqrt %35 : vector<16x1xf32>
      %37 = vector.broadcast %36 : vector<16x1xf32> to vector<16x128xf32>
      %38 = arith.mulf %33, %37 : vector<16x128xf32>
      %c0_22 = arith.constant 0 : index
      %c0_23 = arith.constant 0 : index
      %39 = vector.load %arg6[%c0_22, %c0_23] : memref<1x128xf32, #tpu.memory_space<vmem>>, vector<1x128xf32>
      %40 = vector.broadcast %39 : vector<1x128xf32> to vector<16x128xf32>
      %41 = arith.mulf %38, %40 : vector<16x128xf32>
      %c0_24 = arith.constant 0 : index
      %c0_25 = arith.constant 0 : index
      %42 = vector.load %arg7[%c0_24, %c0_25] : memref<1x128xf32, #tpu.memory_space<vmem>>, vector<1x128xf32>
      %43 = vector.broadcast %42 : vector<1x128xf32> to vector<16x128xf32>
      %44 = arith.addf %41, %43 : vector<16x128xf32>
      %c0_26 = arith.constant 0 : index
      %c0_27 = arith.constant 0 : index
      %45 = vector.load %arg8[%c0_26, %c0_27] : memref<16x128xf32, #tpu.memory_space<vmem>>, vector<16x128xf32>
      tpu.vector_store %arg8[%c0_26, %c0_27], %44 {strides = array<i32>} : memref<16x128xf32, #tpu.memory_space<vmem>>, vector<16x128xf32>,
    } else {
    }
    return
  }
  func.func @transform_0(%arg0: i32, %arg1: i32) -> (i32, i32) {
    %c0_i32 = arith.constant 0 : i32
    return %arg0, %arg1 : i32, i32
  }
  func.func @transform_1(%arg0: i32, %arg1: i32) -> (i32, i32) {
    %c0_i32 = arith.constant 0 : i32
    %c0_i32_0 = arith.constant 0 : i32
    return %arg1, %c0_i32 : i32, i32
  }
  func.func @transform_2(%arg0: i32, %arg1: i32) -> (i32, i32) {
    %c0_i32 = arith.constant 0 : i32
    %c0_i32_0 = arith.constant 0 : i32
    %c0_i32_1 = arith.constant 0 : i32
    return %c0_i32, %c0_i32_0 : i32, i32
  }
  func.func @transform_3(%arg0: i32, %arg1: i32) -> (i32, i32) {
    %c0_i32 = arith.constant 0 : i32
    %c0_i32_0 = arith.constant 0 : i32
    return %arg0, %c0_i32 : i32, i32
  }
  func.func @transform_4(%arg0: i32, %arg1: i32) -> (i32, i32) {
    %c0_i32 = arith.constant 0 : i32
    %c0_i32_0 = arith.constant 0 : i32
    %c0_i32_1 = arith.constant 0 : i32
    return %c0_i32, %c0_i32_0 : i32, i32
  }
  func.func @transform_5(%arg0: i32, %arg1: i32) -> (i32, i32) {
    %c0_i32 = arith.constant 0 : i32
    %c0_i32_0 = arith.constant 0 : i32
    %c0_i32_1 = arith.constant 0 : i32
    return %c0_i32, %c0_i32_0 : i32, i32
  }
  func.func @transform_6(%arg0: i32, %arg1: i32) -> (i32, i32) {
    %c0_i32 = arith.constant 0 : i32
    %c0_i32_0 = arith.constant 0 : i32
    return %arg0, %c0_i32 : i32, i32
  }
}

module attributes {stable_mosaic.version = 11 : i64} {
  func.func @_linear_kernel(%arg0: i32, %arg1: i32, %arg2: i32, %arg3: memref<16x128xf32, #tpu.memory_space<vmem>>, %arg4: memref<128x128xbf16, #tpu.memory_space<vmem>>, %arg5: memref<1x128xf32, #tpu.memory_space<vmem>>, %arg6: memref<16x128xf32, #tpu.memory_space<vmem>>) attributes {dimension_semantics = [#tpu.dimension_semantics<parallel>, #tpu.dimension_semantics<parallel>, #tpu.dimension_semantics<arbitrary>], iteration_bounds = array<i64: 1, 1, 1>, scalar_prefetch = 0 : i64, scratch_operands = 0 : i64, tpu.core_type = #tpu.core_type<tc>, window_params = [{transform_indices = @transform_0, window_bounds = array<i64: 16, 128>}, {transform_indices = @transform_1, window_bounds = array<i64: 128, 128>}, {transform_indices = @transform_2, window_bounds = array<i64: 1, 128>}, {transform_indices = @transform_3, window_bounds = array<i64: 16, 128>}]} {
    %c0_i32 = arith.constant 0 : i32
    %0 = arith.cmpi eq, %arg2, %c0_i32 : i32
    %1 = arith.extui %0 : i1 to i32
    %c0_i32_0 = arith.constant 0 : i32
    %2 = arith.cmpi ne, %1, %c0_i32_0 : i32
    scf.if %2 {
      %cst_10 = arith.constant 0.000000e+00 : f32
      %13 = vector.broadcast %cst_10 : f32 to vector<16x128xf32>
      %c0_11 = arith.constant 0 : index
      %c0_12 = arith.constant 0 : index
      %14 = vector.load %arg6[%c0_11, %c0_12] : memref<16x128xf32, #tpu.memory_space<vmem>>, vector<16x128xf32>
      tpu.vector_store %arg6[%c0_11, %c0_12], %13 {strides = array<i32>} : memref<16x128xf32, #tpu.memory_space<vmem>>, vector<16x128xf32>,
    } else {
    }
    %c0 = arith.constant 0 : index
    %c0_1 = arith.constant 0 : index
    %3 = vector.load %arg6[%c0, %c0_1] : memref<16x128xf32, #tpu.memory_space<vmem>>, vector<16x128xf32>
    %c0_2 = arith.constant 0 : index
    %c0_3 = arith.constant 0 : index
    %4 = vector.load %arg3[%c0_2, %c0_3] : memref<16x128xf32, #tpu.memory_space<vmem>>, vector<16x128xf32>
    %5 = arith.truncf %4 : vector<16x128xf32> to vector<16x128xbf16>
    %c0_4 = arith.constant 0 : index
    %c0_5 = arith.constant 0 : index
    %6 = vector.load %arg4[%c0_4, %c0_5] : memref<128x128xbf16, #tpu.memory_space<vmem>>, vector<128x128xbf16>
    %cst = arith.constant dense<0.000000e+00> : vector<16x128xf32>
    %7 = tpu.matmul %5, %6, %cst {dimension_numbers = #tpu.dot_dimension_numbers<[1], [0], [0], [1], [0, 0, 1, 1], [], []>} : vector<16x128xbf16>, vector<128x128xbf16>, vector<16x128xf32> -> vector<16x128xf32>
    %8 = arith.addf %3, %7 : vector<16x128xf32>
    %c0_6 = arith.constant 0 : index
    %c0_7 = arith.constant 0 : index
    %9 = vector.load %arg6[%c0_6, %c0_7] : memref<16x128xf32, #tpu.memory_space<vmem>>, vector<16x128xf32>
    tpu.vector_store %arg6[%c0_6, %c0_7], %8 {strides = array<i32>} : memref<16x128xf32, #tpu.memory_space<vmem>>, vector<16x128xf32>,
    %c0_i32_8 = arith.constant 0 : i32
    %10 = arith.cmpi eq, %arg2, %c0_i32_8 : i32
    %11 = arith.extui %10 : i1 to i32
    %c0_i32_9 = arith.constant 0 : i32
    %12 = arith.cmpi ne, %11, %c0_i32_9 : i32
    scf.if %12 {
      %c0_10 = arith.constant 0 : index
      %c0_11 = arith.constant 0 : index
      %13 = vector.load %arg6[%c0_10, %c0_11] : memref<16x128xf32, #tpu.memory_space<vmem>>, vector<16x128xf32>
      %c0_12 = arith.constant 0 : index
      %c0_13 = arith.constant 0 : index
      %14 = vector.load %arg5[%c0_12, %c0_13] : memref<1x128xf32, #tpu.memory_space<vmem>>, vector<1x128xf32>
      %15 = vector.broadcast %14 : vector<1x128xf32> to vector<16x128xf32>
      %16 = arith.addf %13, %15 : vector<16x128xf32>
      %cst_14 = arith.constant 0.000000e+00 : f32
      %17 = vector.broadcast %cst_14 : f32 to vector<16x128xf32>
      %18 = arith.maximumf %16, %17 : vector<16x128xf32>
      %c0_15 = arith.constant 0 : index
      %c0_16 = arith.constant 0 : index
      %19 = vector.load %arg6[%c0_15, %c0_16] : memref<16x128xf32, #tpu.memory_space<vmem>>, vector<16x128xf32>
      tpu.vector_store %arg6[%c0_15, %c0_16], %18 {strides = array<i32>} : memref<16x128xf32, #tpu.memory_space<vmem>>, vector<16x128xf32>,
    } else {
    }
    return
  }
  func.func @transform_0(%arg0: i32, %arg1: i32, %arg2: i32) -> (i32, i32) {
    %c0_i32 = arith.constant 0 : i32
    return %arg0, %arg2 : i32, i32
  }
  func.func @transform_1(%arg0: i32, %arg1: i32, %arg2: i32) -> (i32, i32) {
    %c0_i32 = arith.constant 0 : i32
    return %arg2, %arg1 : i32, i32
  }
  func.func @transform_2(%arg0: i32, %arg1: i32, %arg2: i32) -> (i32, i32) {
    %c0_i32 = arith.constant 0 : i32
    %c0_i32_0 = arith.constant 0 : i32
    return %c0_i32, %arg1 : i32, i32
  }
  func.func @transform_3(%arg0: i32, %arg1: i32, %arg2: i32) -> (i32, i32) {
    %c0_i32 = arith.constant 0 : i32
    return %arg0, %arg1 : i32, i32
  }
}

module attributes {stable_mosaic.version = 11 : i64} {
  func.func @_mlp_head_kernel(%arg0: i32, %arg1: memref<16x128xf32, #tpu.memory_space<vmem>>, %arg2: memref<128x128xbf16, #tpu.memory_space<vmem>>, %arg3: memref<1x128xf32, #tpu.memory_space<vmem>>, %arg4: memref<128x128xbf16, #tpu.memory_space<vmem>>, %arg5: memref<1x128xf32, #tpu.memory_space<vmem>>, %arg6: memref<128x128xbf16, #tpu.memory_space<vmem>>, %arg7: memref<1x128xf32, #tpu.memory_space<vmem>>, %arg8: memref<16x128xf32, #tpu.memory_space<vmem>>) attributes {dimension_semantics = [#tpu.dimension_semantics<parallel>], iteration_bounds = array<i64: 1>, scalar_prefetch = 0 : i64, scratch_operands = 0 : i64, tpu.core_type = #tpu.core_type<tc>, window_params = [{transform_indices = @transform_0, window_bounds = array<i64: 16, 128>}, {pipeline_mode = #tpu.pipeline_mode<synchronous>, transform_indices = @transform_1, window_bounds = array<i64: 128, 128>}, {pipeline_mode = #tpu.pipeline_mode<synchronous>, transform_indices = @transform_2, window_bounds = array<i64: 1, 128>}, {pipeline_mode = #tpu.pipeline_mode<synchronous>, transform_indices = @transform_3, window_bounds = array<i64: 128, 128>}, {pipeline_mode = #tpu.pipeline_mode<synchronous>, transform_indices = @transform_4, window_bounds = array<i64: 1, 128>}, {pipeline_mode = #tpu.pipeline_mode<synchronous>, transform_indices = @transform_5, window_bounds = array<i64: 128, 128>}, {pipeline_mode = #tpu.pipeline_mode<synchronous>, transform_indices = @transform_6, window_bounds = array<i64: 1, 128>}, {transform_indices = @transform_7, window_bounds = array<i64: 16, 128>}]} {
    %c0 = arith.constant 0 : index
    %c0_0 = arith.constant 0 : index
    %0 = vector.load %arg1[%c0, %c0_0] : memref<16x128xf32, #tpu.memory_space<vmem>>, vector<16x128xf32>
    %1 = arith.truncf %0 : vector<16x128xf32> to vector<16x128xbf16>
    %c0_1 = arith.constant 0 : index
    %c0_2 = arith.constant 0 : index
    %2 = vector.load %arg2[%c0_1, %c0_2] : memref<128x128xbf16, #tpu.memory_space<vmem>>, vector<128x128xbf16>
    %cst = arith.constant dense<0.000000e+00> : vector<16x128xf32>
    %3 = tpu.matmul %1, %2, %cst {dimension_numbers = #tpu.dot_dimension_numbers<[1], [0], [0], [1], [0, 0, 1, 1], [], []>} : vector<16x128xbf16>, vector<128x128xbf16>, vector<16x128xf32> -> vector<16x128xf32>
    %c0_3 = arith.constant 0 : index
    %c0_4 = arith.constant 0 : index
    %4 = vector.load %arg3[%c0_3, %c0_4] : memref<1x128xf32, #tpu.memory_space<vmem>>, vector<1x128xf32>
    %5 = vector.broadcast %4 : vector<1x128xf32> to vector<16x128xf32>
    %6 = arith.addf %3, %5 : vector<16x128xf32>
    %cst_5 = arith.constant 0.000000e+00 : f32
    %7 = vector.broadcast %cst_5 : f32 to vector<16x128xf32>
    %8 = arith.maximumf %6, %7 : vector<16x128xf32>
    %9 = arith.truncf %8 : vector<16x128xf32> to vector<16x128xbf16>
    %c0_6 = arith.constant 0 : index
    %c0_7 = arith.constant 0 : index
    %10 = vector.load %arg4[%c0_6, %c0_7] : memref<128x128xbf16, #tpu.memory_space<vmem>>, vector<128x128xbf16>
    %cst_8 = arith.constant dense<0.000000e+00> : vector<16x128xf32>
    %11 = tpu.matmul %9, %10, %cst_8 {dimension_numbers = #tpu.dot_dimension_numbers<[1], [0], [0], [1], [0, 0, 1, 1], [], []>} : vector<16x128xbf16>, vector<128x128xbf16>, vector<16x128xf32> -> vector<16x128xf32>
    %c0_9 = arith.constant 0 : index
    %c0_10 = arith.constant 0 : index
    %12 = vector.load %arg5[%c0_9, %c0_10] : memref<1x128xf32, #tpu.memory_space<vmem>>, vector<1x128xf32>
    %13 = vector.broadcast %12 : vector<1x128xf32> to vector<16x128xf32>
    %14 = arith.addf %11, %13 : vector<16x128xf32>
    %cst_11 = arith.constant 0.000000e+00 : f32
    %15 = vector.broadcast %cst_11 : f32 to vector<16x128xf32>
    %16 = arith.maximumf %14, %15 : vector<16x128xf32>
    %17 = arith.truncf %16 : vector<16x128xf32> to vector<16x128xbf16>
    %c0_12 = arith.constant 0 : index
    %c0_13 = arith.constant 0 : index
    %18 = vector.load %arg6[%c0_12, %c0_13] : memref<128x128xbf16, #tpu.memory_space<vmem>>, vector<128x128xbf16>
    %cst_14 = arith.constant dense<0.000000e+00> : vector<16x128xf32>
    %19 = tpu.matmul %17, %18, %cst_14 {dimension_numbers = #tpu.dot_dimension_numbers<[1], [0], [0], [1], [0, 0, 1, 1], [], []>} : vector<16x128xbf16>, vector<128x128xbf16>, vector<16x128xf32> -> vector<16x128xf32>
    %c0_15 = arith.constant 0 : index
    %c0_16 = arith.constant 0 : index
    %20 = vector.load %arg7[%c0_15, %c0_16] : memref<1x128xf32, #tpu.memory_space<vmem>>, vector<1x128xf32>
    %21 = vector.broadcast %20 : vector<1x128xf32> to vector<16x128xf32>
    %22 = arith.addf %19, %21 : vector<16x128xf32>
    %c0_17 = arith.constant 0 : index
    %c0_18 = arith.constant 0 : index
    %23 = vector.load %arg8[%c0_17, %c0_18] : memref<16x128xf32, #tpu.memory_space<vmem>>, vector<16x128xf32>
    tpu.vector_store %arg8[%c0_17, %c0_18], %22 {strides = array<i32>} : memref<16x128xf32, #tpu.memory_space<vmem>>, vector<16x128xf32>,
    return
  }
  func.func @transform_0(%arg0: i32) -> (i32, i32) {
    %c0_i32 = arith.constant 0 : i32
    %c0_i32_0 = arith.constant 0 : i32
    return %arg0, %c0_i32 : i32, i32
  }
  func.func @transform_1(%arg0: i32) -> (i32, i32) {
    %c0_i32 = arith.constant 0 : i32
    %c0_i32_0 = arith.constant 0 : i32
    %c0_i32_1 = arith.constant 0 : i32
    return %c0_i32, %c0_i32_0 : i32, i32
  }
  func.func @transform_2(%arg0: i32) -> (i32, i32) {
    %c0_i32 = arith.constant 0 : i32
    %c0_i32_0 = arith.constant 0 : i32
    %c0_i32_1 = arith.constant 0 : i32
    return %c0_i32, %c0_i32_0 : i32, i32
  }
  func.func @transform_3(%arg0: i32) -> (i32, i32) {
    %c0_i32 = arith.constant 0 : i32
    %c0_i32_0 = arith.constant 0 : i32
    %c0_i32_1 = arith.constant 0 : i32
    return %c0_i32, %c0_i32_0 : i32, i32
  }
  func.func @transform_4(%arg0: i32) -> (i32, i32) {
    %c0_i32 = arith.constant 0 : i32
    %c0_i32_0 = arith.constant 0 : i32
    %c0_i32_1 = arith.constant 0 : i32
    return %c0_i32, %c0_i32_0 : i32, i32
  }
  func.func @transform_5(%arg0: i32) -> (i32, i32) {
    %c0_i32 = arith.constant 0 : i32
    %c0_i32_0 = arith.constant 0 : i32
    %c0_i32_1 = arith.constant 0 : i32
    return %c0_i32, %c0_i32_0 : i32, i32
  }
  func.func @transform_6(%arg0: i32) -> (i32, i32) {
    %c0_i32 = arith.constant 0 : i32
    %c0_i32_0 = arith.constant 0 : i32
    %c0_i32_1 = arith.constant 0 : i32
    return %c0_i32, %c0_i32_0 : i32, i32
  }
  func.func @transform_7(%arg0: i32) -> (i32, i32) {
    %c0_i32 = arith.constant 0 : i32
    %c0_i32_0 = arith.constant 0 : i32
    return %arg0, %c0_i32 : i32, i32
  }
}

</mosaic_0001>

<bundles_post_ra>
// kernel: _lambda_.10
= control target key start
LH: loop header
LB: loop body
LE: loop exit
PB: predicated region body
PF: predicated region fallthrough
CT: control target
= control target key end

     0   :  { %v203_v0 = vmov 0.0   ;;  %vm204_vm0 = vmmov 0   ;;  %s264_s1 = inlined_call_operand.vmem [shape: bf16[128,128], index: 1, kind: input, shape index: {}]   ;;  %s265_s0 = inlined_call_operand.vmem [shape: f32[16,128], index: 0, kind: input, shape index: {}]   ;;  %s266_s2 = inlined_call_operand.vmem [shape: f32[1,128], index: 2, kind: input, shape index: {}]   ;;  %s267_s3 = inlined_call_operand.vmem [shape: f32[16,128], index: 3, kind: output, shape index: {}]  }
   0x1   :  { %173 = vmatprep.subr.bf16.mxu0 %v203_v0  ;;  %v195_v1 = vld [vmem:[%s264_s1] sm:$0xff]   ;;  %189 = vmatprep.mubr.msk.bf16.mxu0 %vm204_vm0, %v203_v0  ;;  %v196_v2 = vld [vmem:[%s264_s1 + $0x8] sm:$0xff]   ;;  %v197_v3 = vld [vmem:[%s264_s1 + $0x10] sm:$0xff]  }
   0x2   :  { %174 = vmatpush3.bf16.msra.mxu0 %v195_v1  ;;  %v198_v4 = vld [vmem:[%s264_s1 + $0x18] sm:$0xff]   ;;  %v199_v5 = vld [vmem:[%s264_s1 + $0x20] sm:$0xff]   ;;  %v200_v6 = vld [vmem:[%s264_s1 + $0x28] sm:$0xff]  }
   0x3   :  { %175 = vmatprep.subr.bf16.mxu0 %v203_v0  ;;  %v201_v7 = vld [vmem:[%s264_s1 + $0x30] sm:$0xff]   ;;  %v202_v8 = vld [vmem:[%s264_s1 + $0x38] sm:$0xff]   ;;  %v23_v9 = vld [vmem:[%s265_s0] sm:$0xff] }
   0x4   :  { %v24_v10 = vld [vmem:[%s265_s0 + $0x8] sm:$0xff]  ;;  %v163_v13 = vld [vmem:[%s266_s2] ss:$0 sm:$0xff] }
   0x5   :  { %v25_v11 = vpack.c.bf16 %v24_v10, %v23_v9 }
   0x6   :  { %176 = vmatpush3.bf16.msra.mxu0 %v196_v2 }
   0x7   :  { %177 = vmatprep.subr.bf16.mxu0 %v203_v0 }
   0xa   :  { %178 = vmatpush3.bf16.msra.mxu0 %v197_v3 }
   0xb   :  { %179 = vmatprep.subr.bf16.mxu0 %v203_v0 }
   0xe   :  { %180 = vmatpush3.bf16.msra.mxu0 %v198_v4 }
   0xf   :  { %181 = vmatprep.subr.bf16.mxu0 %v203_v0 }
  0x12   :  { %182 = vmatpush3.bf16.msra.mxu0 %v199_v5 }
  0x13   :  { %183 = vmatprep.subr.bf16.mxu0 %v203_v0 }
  0x16   :  { %184 = vmatpush3.bf16.msra.mxu0 %v200_v6 }
  0x17   :  { %185 = vmatprep.subr.bf16.mxu0 %v203_v0 }
  0x1a   :  { %186 = vmatpush3.bf16.msra.mxu0 %v201_v7 }
  0x1b   :  { %187 = vmatprep.subr.bf16.mxu0 %v203_v0 }
  0x1e   :  { %188 = vmatpush3.bf16.msra.mxu0 %v202_v8 }
  0x21   :  { %190 = vmatmul.mubr.bf16.vlgmr.msra.gmra.mrb[0].mxu0 %v25_v11 }
  0xf4   :  { %v124_v12 = vpop.f32.mrb[0].mxu0 }
  0xf5   :  { %v191_v14 = vpop.f32.mrb[1].mxu0  ;;  %v147_v16 = vadd.f32 %v163_v13, %v124_v12 }
  0xf6   :  { %v127_v15 = vpop.f32.mrb[2].mxu0 }
  0xf7   :  { %v192_v17 = vpop.f32.mrb[3].mxu0  ;;  %149 = vst [vmem:[%s267_s3] sm:$0xff] %v147_v16  ;;  %v148_v18 = vadd.f32 %v163_v13, %v127_v15 }
  0xf9   :  { %150 = vst [vmem:[%s267_s3 + $0x8] sm:$0xff] %v148_v18 }

// kernel: _lambda_.13
= control target key start
LH: loop header
LB: loop body
LE: loop exit
PB: predicated region body
PF: predicated region fallthrough
CT: control target
= control target key end

     0   :  { %v205_v0 = vmov 0.0   ;;  %vm206_vm0 = vmmov 0   ;;  %s266_s1 = inlined_call_operand.vmem [shape: bf16[128,128], index: 1, kind: input, shape index: {}]   ;;  %s267_s0 = inlined_call_operand.vmem [shape: f32[16,128], index: 0, kind: input, shape index: {}]   ;;  %s268_s2 = inlined_call_operand.vmem [shape: f32[1,128], index: 2, kind: input, shape index: {}]   ;;  %s269_s3 = inlined_call_operand.vmem [shape: f32[16,128], index: 3, kind: output, shape index: {}]  }
   0x1   :  { %175 = vmatprep.subr.bf16.mxu0 %v205_v0  ;;  %v197_v1 = vld [vmem:[%s266_s1] sm:$0xff]   ;;  %191 = vmatprep.mubr.msk.bf16.mxu0 %vm206_vm0, %v205_v0  ;;  %v198_v2 = vld [vmem:[%s266_s1 + $0x8] sm:$0xff]   ;;  %v199_v3 = vld [vmem:[%s266_s1 + $0x10] sm:$0xff]  }
   0x2   :  { %176 = vmatpush3.bf16.msra.mxu0 %v197_v1  ;;  %v200_v4 = vld [vmem:[%s266_s1 + $0x18] sm:$0xff]   ;;  %v201_v5 = vld [vmem:[%s266_s1 + $0x20] sm:$0xff]   ;;  %v202_v6 = vld [vmem:[%s266_s1 + $0x28] sm:$0xff]  }
   0x3   :  { %177 = vmatprep.subr.bf16.mxu0 %v205_v0  ;;  %v203_v7 = vld [vmem:[%s266_s1 + $0x30] sm:$0xff]   ;;  %v204_v8 = vld [vmem:[%s266_s1 + $0x38] sm:$0xff]   ;;  %v23_v9 = vld [vmem:[%s267_s0] sm:$0xff] }
   0x4   :  { %v24_v10 = vld [vmem:[%s267_s0 + $0x8] sm:$0xff]  ;;  %v165_v13 = vld [vmem:[%s268_s2] ss:$0 sm:$0xff] }
   0x5   :  { %v25_v11 = vpack.c.bf16 %v24_v10, %v23_v9 }
   0x6   :  { %178 = vmatpush3.bf16.msra.mxu0 %v198_v2 }
   0x7   :  { %179 = vmatprep.subr.bf16.mxu0 %v205_v0 }
   0xa   :  { %180 = vmatpush3.bf16.msra.mxu0 %v199_v3 }
   0xb   :  { %181 = vmatprep.subr.bf16.mxu0 %v205_v0 }
   0xe   :  { %182 = vmatpush3.bf16.msra.mxu0 %v200_v4 }
   0xf   :  { %183 = vmatprep.subr.bf16.mxu0 %v205_v0 }
  0x12   :  { %184 = vmatpush3.bf16.msra.mxu0 %v201_v5 }
  0x13   :  { %185 = vmatprep.subr.bf16.mxu0 %v205_v0 }
  0x16   :  { %186 = vmatpush3.bf16.msra.mxu0 %v202_v6 }
  0x17   :  { %187 = vmatprep.subr.bf16.mxu0 %v205_v0 }
  0x1a   :  { %188 = vmatpush3.bf16.msra.mxu0 %v203_v7 }
  0x1b   :  { %189 = vmatprep.subr.bf16.mxu0 %v205_v0 }
  0x1e   :  { %190 = vmatpush3.bf16.msra.mxu0 %v204_v8 }
  0x21   :  { %192 = vmatmul.mubr.bf16.vlgmr.msra.gmra.mrb[0].mxu0 %v25_v11 }
  0xf4   :  { %v124_v12 = vpop.f32.mrb[0].mxu0 }
  0xf5   :  { %v193_v14 = vpop.f32.mrb[1].mxu0  ;;  %v147_v16 = vadd.f32 %v165_v13, %v124_v12 }
  0xf6   :  { %v127_v15 = vpop.f32.mrb[2].mxu0 }
  0xf7   :  { %v194_v17 = vpop.f32.mrb[3].mxu0  ;;  %v149_v18 = vmax.f32 %v147_v16, 0.0  ;;  %v148_v19 = vadd.f32 %v165_v13, %v127_v15 }
  0xf9   :  { %151 = vst [vmem:[%s269_s3] sm:$0xff] %v149_v18  ;;  %v150_v20 = vmax.f32 %v148_v19, 0.0 }
  0xfb   :  { %152 = vst [vmem:[%s269_s3 + $0x8] sm:$0xff] %v150_v20 }

// kernel: _lambda_.12
= control target key start
LH: loop header
LB: loop body
LE: loop exit
PB: predicated region body
PF: predicated region fallthrough
CT: control target
= control target key end

     0   :  { %v268_v0 = vmov 0.0   ;;  %vm269_vm0 = vmmov 0   ;;  %s356_s1 = inlined_call_operand.vmem [shape: bf16[128,128], index: 1, kind: input, shape index: {}]   ;;  %s357_s0 = inlined_call_operand.vmem [shape: f32[16,128], index: 0, kind: input, shape index: {}]   ;;  %s358_s2 = inlined_call_operand.vmem [shape: f32[1,128], index: 2, kind: input, shape index: {}, may-alias: {2,5}]   ;;  %s359_s3 = inlined_call_operand.vmem [shape: f32[16,128], index: 3, kind: input, shape index: {}]   ;;  %s360_s4 = inlined_call_operand.vmem [shape: f32[1,128], index: 4, kind: input, shape index: {}]   ;;  %s361_s5 = inlined_call_operand.vmem [shape: f32[1,128], index: 5, kind: input, shape index: {}, may-alias: {2,5}]   ;;  %s362_s6 = inlined_call_operand.vmem [shape: f32[16,128], index: 6, kind: output, shape index: {}]  }
   0x1   :  { %234 = vmatprep.subr.bf16.mxu0 %v268_v0  ;;  %v256_v1 = vld [vmem:[%s356_s1] sm:$0xff]   ;;  %250 = vmatprep.mubr.msk.bf16.mxu0 %vm269_vm0, %v268_v0  ;;  %v257_v2 = vld [vmem:[%s356_s1 + $0x8] sm:$0xff]   ;;  %v258_v3 = vld [vmem:[%s356_s1 + $0x10] sm:$0xff]  }
   0x2   :  { %235 = vmatpush3.bf16.msra.mxu0 %v256_v1  ;;  %v259_v4 = vld [vmem:[%s356_s1 + $0x18] sm:$0xff]   ;;  %v260_v5 = vld [vmem:[%s356_s1 + $0x20] sm:$0xff]   ;;  %v261_v6 = vld [vmem:[%s356_s1 + $0x28] sm:$0xff]  }
   0x3   :  { %236 = vmatprep.subr.bf16.mxu0 %v268_v0  ;;  %v262_v7 = vld [vmem:[%s356_s1 + $0x30] sm:$0xff]   ;;  %v263_v8 = vld [vmem:[%s356_s1 + $0x38] sm:$0xff]   ;;  %v32_v9 = vld [vmem:[%s357_s0] sm:$0xff] }
   0x4   :  { %v33_v10 = vld [vmem:[%s357_s0 + $0x8] sm:$0xff]  ;;  %v222_v13 = vld [vmem:[%s358_s2] ss:$0 sm:$0xff] }
   0x5   :  { %v34_v11 = vpack.c.bf16 %v33_v10, %v32_v9  ;;  %v158_v16 = vld [vmem:[%s359_s3] sm:$0xff]  ;;  %v159_v19 = vld [vmem:[%s359_s3 + $0x8] sm:$0xff] }
   0x6   :  { %237 = vmatpush3.bf16.msra.mxu0 %v257_v2  ;;  %v223_v43 = vld [vmem:[%s360_s4] ss:$0 sm:$0xff] }
   0x7   :  { %238 = vmatprep.subr.bf16.mxu0 %v268_v0  ;;  %v224_v45 = vld [vmem:[%s361_s5] ss:$0 sm:$0xff] }
   0xa   :  { %239 = vmatpush3.bf16.msra.mxu0 %v258_v3 }
   0xb   :  { %240 = vmatprep.subr.bf16.mxu0 %v268_v0 }
   0xe   :  { %241 = vmatpush3.bf16.msra.mxu0 %v259_v4 }
   0xf   :  { %242 = vmatprep.subr.bf16.mxu0 %v268_v0 }
  0x12   :  { %243 = vmatpush3.bf16.msra.mxu0 %v260_v5 }
  0x13   :  { %244 = vmatprep.subr.bf16.mxu0 %v268_v0 }
  0x16   :  { %245 = vmatpush3.bf16.msra.mxu0 %v261_v6 }
  0x17   :  { %246 = vmatprep.subr.bf16.mxu0 %v268_v0 }
  0x1a   :  { %247 = vmatpush3.bf16.msra.mxu0 %v262_v7 }
  0x1b   :  { %248 = vmatprep.subr.bf16.mxu0 %v268_v0 }
  0x1e   :  { %249 = vmatpush3.bf16.msra.mxu0 %v263_v8 }
  0x21   :  { %251 = vmatmul.mubr.bf16.vlgmr.msra.gmra.mrb[0].mxu0 %v34_v11 }
  0xf4   :  { %v133_v12 = vpop.f32.mrb[0].mxu0 }
  0xf5   :  { %v252_v14 = vpop.f32.mrb[1].mxu0  ;;  %v156_v18 = vadd.f32 %v222_v13, %v133_v12 }
  0xf6   :  { %v136_v15 = vpop.f32.mrb[2].mxu0 }
  0xf7   :  { %v253_v17 = vpop.f32.mrb[3].mxu0  ;;  %v160_v20 = vadd.f32 %v158_v16, %v156_v18  ;;  %v157_v21 = vadd.f32 %v222_v13, %v136_v15 }
  0xf9   :  { %162 = vadd.xlane.f32.xlu0 %v160_v20  ;;  %v168_v22 = vmul.f32 %v160_v20, %v160_v20  ;;  %v161_v23 = vadd.f32 %v159_v19, %v157_v21 }
  0xfb   :  { %170 = vadd.xlane.f32.xlu1 %v168_v22  ;;  %v169_v24 = vmul.f32 %v161_v23, %v161_v23 }
  0xfd   :  { %164 = vadd.xlane.f32.xlu0 %v161_v23 }
  0xff   :  { %172 = vadd.xlane.f32.xlu1 %v169_v24 }
 0x186   :  { %v163_v25 = vpop.xlane.xlu0 %162 }
 0x187   :  { %v166_v26 = vmul.f32 0.03125, %v163_v25 }
 0x188   :  { %v171_v27 = vpop.xlane.xlu1 %170 }
 0x189   :  { %v176_v28 = vmul.f32 %v166_v26, %v166_v26  ;;  %v174_v29 = vmul.f32 0.03125, %v171_v27  ;;  %v182_v41 = vsub.f32 %v160_v20, %v166_v26 }
 0x18a   :  { %v165_v30 = vpop.xlane.xlu0 %164 }
 0x18b   :  { %v178_v31 = vsub.f32 %v174_v29, %v176_v28  ;;  %v167_v32 = vmul.f32 0.03125, %v165_v30 }
 0x18c   :  { %v173_v33 = vpop.xlane.xlu1 %172 }
 0x18d   :  { %v180_v34 = vmax.f32 %v178_v31, 0.0  ;;  %v177_v35 = vmul.f32 %v167_v32, %v167_v32  ;;  %v175_v36 = vmul.f32 0.03125, %v173_v33  ;;  %v183_v47 = vsub.f32 %v161_v23, %v167_v32 }
 0x18f   :  { %v184_v37 = vadd.f32 1e-05, %v180_v34  ;;  %v179_v38 = vsub.f32 %v175_v36, %v177_v35 }
 0x191   :  { %264 = vrsqrt.f32 %v184_v37  ;;  %v181_v39 = vmax.f32 %v179_v38, 0.0 }
 0x193   :  { %v185_v40 = vadd.f32 1e-05, %v181_v39 }
 0x195   :  { %266 = vrsqrt.f32 %v185_v40 }
 0x19b   :  { %v265_v42 = vpop.eup %264 }
 0x19c   :  { %v188_v44 = vmul.f32 %v265_v42, %v182_v41 }
 0x19e   :  { %v197_v46 = vmul.f32 %v223_v43, %v188_v44 }
 0x19f   :  { %v267_v48 = vpop.eup %266 }
 0x1a0   :  { %v206_v49 = vadd.f32 %v224_v45, %v197_v46  ;;  %v189_v50 = vmul.f32 %v267_v48, %v183_v47 }
 0x1a2   :  { %208 = vst [vmem:[%s362_s6] sm:$0xff] %v206_v49  ;;  %v198_v51 = vmul.f32 %v223_v43, %v189_v50 }
 0x1a4   :  { %v207_v52 = vadd.f32 %v224_v45, %v198_v51 }
 0x1a6   :  { %209 = vst [vmem:[%s362_s6 + $0x8] sm:$0xff] %v207_v52 }

// kernel: _lambda_.11
= control target key start
LH: loop header
LB: loop body
LE: loop exit
PB: predicated region body
PF: predicated region fallthrough
CT: control target
= control target key end

     0   :  { %s1281_s12 = smov 0   ;;  %s1283_s13 = smov 0   ;;  %s1471_s0 = inlined_call_operand.vmem [shape: f32[2,8,128], index: 0, kind: input, shape index: {}]   ;;  %s1472_s1 = inlined_call_operand.vmem [shape: bf16[128,384], index: 1, kind: input, shape index: {}]   ;;  %s1473_s2 = inlined_call_operand.vmem [shape: f32[1,384], index: 2, kind: input, shape index: {}]   ;;  %s1474_s3 = inlined_call_operand.vmem [shape: f32[2,8,128], index: 3, kind: output, shape index: {}]  }
   0x1   :  { %s1285_s14 = smov 0  }
   0x2 LB: > { %s25_s15 = sadd.s32 1, %s1246_s13  ;;  %p1010_p0 = scmp.ge.s32.totalorder %s1250_s14, 1  ;;  %s1250_s14 = sphi %s1285_s14, %s13_s14   ;;  %s1246_s13 = sphi %s1283_s13, %s1476_s13   ;;  %s1242_s12 = sphi %s1281_s12, %s1475_s12  }
   0x3   : > { %p27_p1 = scmp.ge.s32.totalorder %s25_s15, 2  ;;  %p150_p2 = scmp.lt.s32.totalorder %s1250_s14, 3 }
   0x5   : > { %s1478_s15 = smov (%p27_p1, %s25_s15), 0  ;;  %p151_p3 = pnand %p1010_p0, %p150_p2 }
   0x6   : > { %v1178_v0 = vld [vmem:[%s1472_s1 + $0x8] ss:$12 sps:$4 sm:$0xff] (!%p151_p3)   ;;  %v1180_v1 = vld [vmem:[%s1472_s1 + $0x4] ss:$12 sps:$4 sm:$0xff] (!%p151_p3)   ;;  %v1252_v2 = vmov (!%p151_p3), 0.0   ;;  %v1253_v3 = vmov (!%p151_p3), 0   ;;  %v211_v28 = vlaneseq (!%p151_p3) }
   0x7   : > { %154 = sbr.rel (%p151_p3) target bundleno = 1110 (0x456), region = 32  ;;  %1077 = vmatprep.subr.bf16.mxu1 (!%p151_p3), %v1252_v2  ;;  %333 = vmatprep.mubr.bf16.mxu0 (!%p151_p3), %v1253_v3  ;;  %v1181_v4 = vld [vmem:[%s1472_s1 + $0x20] ss:$12 sps:$4 sm:$0xff] (!%p151_p3)   ;;  %vm1254_vm0 = vmmov (!%p151_p3), 0   ;;  %v1183_v5 = vld [vmem:[%s1472_s1 + $0x1c] ss:$12 sps:$4 sm:$0xff] (!%p151_p3)  }
   0x8   : > { %301 = vmatprep.subr.bf16.mxu0 (!%p151_p3), %v1178_v0  ;;  %1093 = vmatprep.mubr.msk.bf16.mxu1 (!%p151_p3), %vm1254_vm0, %v1252_v2  ;;  %v1184_v6 = vld [vmem:[%s1472_s1 + $0x38] ss:$12 sps:$4 sm:$0xff] (!%p151_p3)   ;;  %v1190_v7 = vld [vmem:[%s1472_s1] ss:$12 sps:$4 sm:$0xff] (!%p151_p3)   ;;  %v1187_v9 = vld [vmem:[%s1472_s1 + $0x50] ss:$12 sps:$4 sm:$0xff] (!%p151_p3)  }
   0x9   : > { %302 = vmatpush1.bf16.msra.mxu0 (!%p151_p3), %v1180_v1  ;;  %v1186_v8 = vld [vmem:[%s1472_s1 + $0x34] ss:$12 sps:$4 sm:$0xff] (!%p151_p3)   ;;  %1078 = vmatpush3.bf16.msra.mxu1 (!%p151_p3), %v1190_v7  ;;  %v1194_v10 = vld [vmem:[%s1472_s1 + $0x18] ss:$12 sps:$4 sm:$0xff] (!%p151_p3)   ;;  %v1198_v13 = vld [vmem:[%s1472_s1 + $0x30] ss:$12 sps:$4 sm:$0xff] (!%p151_p3)  }
   0xa   : > { %303 = vmatprep.subr.bf16.mxu0 (!%p151_p3), %v1181_v4  ;;  %1079 = vmatprep.subr.bf16.mxu1 (!%p151_p3), %v1252_v2  ;;  %v1189_v11 = vld [vmem:[%s1472_s1 + $0x4c] ss:$12 sps:$4 sm:$0xff] (!%p151_p3)   ;;  %v1191_v12 = vld [vmem:[%s1472_s1 + $0x68] ss:$12 sps:$4 sm:$0xff] (!%p151_p3)   ;;  %p175_p4 = scmp.lt.s32.totalorder (!%p151_p3), %s1242_s12, 1  ;;  %v212_v29 = vshrl.u32 (!%p151_p3), %v211_v28, 7 }
   0xb   : > { %v1193_v14 = vld [vmem:[%s1472_s1 + $0x64] ss:$12 sps:$4 sm:$0xff] (!%p151_p3)   ;;  %v1195_v15 = vld [vmem:[%s1472_s1 + $0x80] ss:$12 sps:$4 sm:$0xff] (!%p151_p3)   ;;  %v1202_v16 = vld [vmem:[%s1472_s1 + $0x48] ss:$12 sps:$4 sm:$0xff] (!%p151_p3)  }
   0xc   : > { %v1197_v17 = vld [vmem:[%s1472_s1 + $0x7c] ss:$12 sps:$4 sm:$0xff] (!%p151_p3)   ;;  %v1199_v18 = vld [vmem:[%s1472_s1 + $0x98] ss:$12 sps:$4 sm:$0xff] (!%p151_p3)   ;;  %v1206_v19 = vld [vmem:[%s1472_s1 + $0x60] ss:$12 sps:$4 sm:$0xff] (!%p151_p3)  }
   0xd   : > { %304 = vmatpush1.bf16.msra.mxu0 (!%p151_p3), %v1183_v5  ;;  %1080 = vmatpush3.bf16.msra.mxu1 (!%p151_p3), %v1194_v10  ;;  %v1201_v20 = vld [vmem:[%s1472_s1 + $0x94] ss:$12 sps:$4 sm:$0xff] (!%p151_p3)   ;;  %v1203_v21 = vld [vmem:[%s1472_s1 + $0xb0] ss:$12 sps:$4 sm:$0xff] (!%p151_p3)   ;;  %v1207_v22 = vld [vmem:[%s1472_s1 + $0x78] ss:$12 sps:$4 sm:$0xff] (!%p151_p3)  }
   0xe   : > { %305 = vmatprep.subr.bf16.mxu0 %v1184_v6  ;;  %1081 = vmatprep.subr.bf16.mxu1 %v1252_v2  ;;  %s1480_s12 = smov (!%p175_p4, %s1242_s12), 1  ;;  %v1205_v23 = vld [vmem:[%s1472_s1 + $0xac] ss:$12 sps:$4 sm:$0xff]   ;;  %v1208_v25 = vld [vmem:[%s1472_s1 + $0x90] ss:$12 sps:$4 sm:$0xff]   ;;  %v213_v30 = vsub.s32 0, %v212_v29 }
   0xf   : > { %s1011_s29 = sshll.u32 %s1480_s12, 3  ;;  %v1209_v27 = vld [vmem:[%s1472_s1 + $0xa8] ss:$12 sps:$4 sm:$0xff]   ;;  %v209_v31 = vld [vmem:[%s1473_s2 + $0x1] sm:$0x3]  ;;  %v217_v32 = vsub.s32 1, %v212_v29 }
  0x10   : > { %s178_s9 = scalar_lea.vmem %s1471_s0, %s1011_s29  ;;  %v214_v33 = vrot.slane %v209_v31, %v213_v30  ;;  %v1030_v42 = vld [vmem:[%s1473_s2] ss:$0 sm:$0xff]  ;;  %vm470_vm1 = vcmask 64512   ;;  %vm530_vm2 = vcmask 1043456   ;;  %s1255_s26 = smov 112   ;;  %vm926_vm3 = vcmask 130048  }
  0x11   : > { %306 = vmatpush1.bf16.msra.mxu0 %v1186_v8  ;;  %1082 = vmatpush3.bf16.msra.mxu1 %v1198_v13  ;;  %v191_v24 = vld [vmem:[%s178_s9] sm:$0xff]  ;;  %v218_v34 = vrot.slane %v209_v31, %v217_v32  ;;  %s1256_s27 = smov 120   ;;  %s1257_s28 = smov 104   ;;  %vm928_vm4 = vcmask 195584   ;;  %vm930_vm5 = vcmask 261120  }
  0x12   : > { %307 = vmatprep.subr.bf16.mxu0 %v1187_v9  ;;  %1083 = vmatprep.subr.bf16.mxu1 %v1252_v2  ;;  %v192_v26 = vpack.c.bf16 %v191_v24, %v191_v24  ;;  %s1258_s30 = smov 8   ;;  %s1259_s4 = smov 16  }
  0x13   : > { %s1260_s5 = smov 24   ;;  %s185_s8 = scalar_lea.vmem %s1474_s3, %s1011_s29 }
  0x15   : > { %308 = vmatpush1.bf16.msra.mxu0 %v1189_v11  ;;  %1084 = vmatpush3.bf16.msra.mxu1 %v1202_v16 }
  0x16   : > { %309 = vmatprep.subr.bf16.mxu0 %v1191_v12  ;;  %1085 = vmatprep.subr.bf16.mxu1 %v1252_v2 }
  0x19   : > { %310 = vmatpush1.bf16.msra.mxu0 %v1193_v14  ;;  %1086 = vmatpush3.bf16.msra.mxu1 %v1206_v19 }
  0x1a   : > { %311 = vmatprep.subr.bf16.mxu0 %v1195_v15  ;;  %1087 = vmatprep.subr.bf16.mxu1 %v1252_v2 }
  0x1d   : > { %312 = vmatpush1.bf16.msra.mxu0 %v1197_v17  ;;  %1088 = vmatpush3.bf16.msra.mxu1 %v1207_v22 }
  0x1e   : > { %313 = vmatprep.subr.bf16.mxu0 %v1199_v18  ;;  %1089 = vmatprep.subr.bf16.mxu1 %v1252_v2 }
  0x21   : > { %314 = vmatpush1.bf16.msra.mxu0 %v1201_v20  ;;  %1090 = vmatpush3.bf16.msra.mxu1 %v1208_v25 }
  0x22   : > { %315 = vmatprep.subr.bf16.mxu0 %v1203_v21  ;;  %1091 = vmatprep.subr.bf16.mxu1 %v1252_v2 }
  0x25   : > { %316 = vmatpush1.bf16.msra.mxu0 %v1205_v23  ;;  %1092 = vmatpush3.bf16.msra.mxu1 %v1209_v27 }
  0x26   : > { %1097 = vmatprep.subr.bf16.mxu0 %v1252_v2  ;;  %1103 = vmatprep.subr.bf16.mxu1 %v1252_v2 }
  0x28   : > { %334 = vmatmul.mubr.bf16.vlgmr.msra.gmra.mrb[0].mxu0 %v192_v26  ;;  %1094 = vmatmul.mubr.bf16.vlgmr.msra.gmra.mrb[0].mxu1 %v192_v26 }
  0x29   : > { %1099 = vmatprep.mubr.msk.bf16.mxu0 %vm1254_vm0, %v1252_v2  ;;  %1105 = vmatprep.mubr.msk.bf16.mxu1 %vm1254_vm0, %v1252_v2 }
  0xfb   : > { %v335_v35 = vpop.f32.mrb[0].mxu0  ;;  %v460_v43 = vpop.f32.mrb[0].mxu1 }
  0xfc   : > { %v336_v36 = vadd.f32 %v335_v35, %v214_v33  ;;  %v337_v37 = vpop.f32.mrb[1].mxu0  ;;  %v1095_v44 = vpop.f32.mrb[1].mxu1  ;;  %v461_v46 = vadd.f32 %v1030_v42, %v460_v43 }
  0xfd   : > { %v338_v38 = vadd.f32 %v337_v37, %v218_v34  ;;  %v339_v39 = vpop.f32.mrb[2].mxu0  ;;  %v463_v45 = vpop.f32.mrb[2].mxu1 }
  0xfe   : > { %v340_v40 = vpop.f32.mrb[3].mxu0  ;;  %v1096_v47 = vpop.f32.mrb[3].mxu1  ;;  %v466_v48 = vmul.f32 0.35355338, %v461_v46 }
  0xff   : > { %v1051_v41 = vpack.c.bf16 %v338_v38, %v336_v36 }
 0x100   : > { %v467_v54 = vpack.c.bf16 %v466_v48, %v466_v48 }
 0x101   : > { %350 = vst [vmem:[#allocation2] sm:$0xff] %v1051_v41 }
 0x108   : > { %v468_v49 = vld [vmem:[#allocation2] sm:$0xf]  ;;  %v469_v50 = vld [vmem:[#allocation2 + $0x4] sm:$0xf] }
 0x109   : > { %v475_v51 = vsel %vm470_vm1, %v468_v49, 0  ;;  %v532_v52 = vsel %vm530_vm2, %v469_v50, 0  ;;  %v1041_v53 = vcombine.low %v468_v49, %v468_v49  ;;  %v1043_v19 = vcombine.low %v469_v50, %v469_v50 }
 0x10a   : > { %1098 = vmatpush3.bf16.xpose.msra.mxu0 %v475_v51  ;;  %1104 = vmatpush3.bf16.msra.mxu1 %v532_v52 }
 0x10b   : > { %695 = vrot.lane.b32.xlu1 %v1041_v53, %s1255_s26  ;;  %582 = vrot.lane.b32.xlu0 %v1041_v53, %s1256_s27 }
 0x10c   : > { %1109 = vmatprep.subr.bf16.mxu0 %v1252_v2  ;;  %1115 = vmatprep.subr.bf16.mxu1 %v1252_v2 }
 0x10f   : > { %693 = vrot.lane.b32.xlu1 %v467_v54, %s1255_s26  ;;  %577 = vrot.lane.b32.xlu0 %v467_v54, %s1256_s27 }
 0x111   : > { %1100 = vmatmul.mubr.msk.bf16.vlgmr.msra.gmra.mrb[4].mxu0 %vm470_vm1, %v467_v54 }
 0x112   : > { %1111 = vmatprep.mubr.msk.bf16.mxu0 %vm1254_vm0, %v1252_v2 }
 0x113   : > { %803 = vrot.lane.b32.xlu1 %v467_v54, %s1257_s28  ;;  %805 = vrot.lane.b32.xlu0 %v1041_v53, %s1257_s28 }
 0x17d   : > { %v583_v55 = vpop.permute.xlu0 %582  ;;  %v696_v57 = vpop.permute.xlu1 %695 }
 0x17e   : > { %v588_v56 = vsel %vm470_vm1, %v583_v55, 0  ;;  %v701_v59 = vsel %vm470_vm1, %v696_v57, 0 }
 0x17f   : > { %1110 = vmatpush3.bf16.xpose.msra.mxu0 %v588_v56 }
 0x180   : > { %1121 = vmatprep.subr.bf16.mxu0 %v1252_v2 }
 0x181   : > { %v578_v58 = vpop.permute.xlu0 %577  ;;  %v694_v61 = vpop.permute.xlu1 %693 }
 0x185   : > { %v806_v60 = vpop.permute.xlu0 %805  ;;  %v804_v63 = vpop.permute.xlu1 %803 }
 0x186   : > { %1112 = vmatmul.mubr.msk.bf16.vlgmr.msra.gmra.mrb[8].mxu0 %vm470_vm1, %v578_v58  ;;  %v811_v62 = vsel %vm470_vm1, %v806_v60, 0 }
 0x187   : > { %1122 = vmatpush3.bf16.xpose.msra.mxu0 %v701_v59  ;;  %1123 = vmatprep.mubr.msk.bf16.mxu0 %vm1254_vm0, %v1252_v2 }
 0x188   : > { %1133 = vmatprep.subr.bf16.mxu0 %v1252_v2 }
 0x18e   : > { %1124 = vmatmul.mubr.msk.bf16.vlgmr.msra.gmra.mrb[12].mxu0 %vm470_vm1, %v694_v61 }
 0x18f   : > { %1134 = vmatpush3.bf16.xpose.msra.mxu0 %v811_v62  ;;  %1135 = vmatprep.mubr.msk.bf16.mxu0 %vm1254_vm0, %v1252_v2 }
 0x196   : > { %1136 = vmatmul.mubr.msk.bf16.vlgmr.msra.gmra.mrb[16].mxu0 %vm470_vm1, %v804_v63 }
 0x1e4   : > { %v511_v0 = vpop.f32.mrb[4].mxu0 }
 0x1e5   : > { %v1101_v1 = vpop.f32.mrb[5].mxu0  ;;  %v517_v3 = vsel %vm470_vm1, %v511_v0, -inf }
 0x1e6   : > { %518 = vmax.xlane.f32.xlu0 %v517_v3  ;;  %v514_v4 = vpop.f32.mrb[6].mxu0 }
 0x1e7   : > { %v1102_v5 = vpop.f32.mrb[7].mxu0 }
 0x259   : > { %v624_v6 = vpop.f32.mrb[8].mxu0 }
 0x25a   : > { %v1113_v7 = vpop.f32.mrb[9].mxu0  ;;  %v630_v8 = vsel %vm470_vm1, %v624_v6, -inf }
 0x25b   : > { %631 = vmax.xlane.f32.xlu1 %v630_v8  ;;  %v627_v9 = vpop.f32.mrb[10].mxu0 }
 0x25c   : > { %v1114_v10 = vpop.f32.mrb[11].mxu0 }
 0x261   : > { %v737_v11 = vpop.f32.mrb[12].mxu0 }
 0x262   : > { %v1125_v12 = vpop.f32.mrb[13].mxu0  ;;  %v743_v13 = vsel %vm470_vm1, %v737_v11, -inf }
 0x263   : > { %744 = vmax.xlane.f32.xlu0 %v743_v13  ;;  %v740_v14 = vpop.f32.mrb[14].mxu0 }
 0x264   : > { %v1126_v15 = vpop.f32.mrb[15].mxu0 }
 0x269   : > { %v847_v16 = vpop.f32.mrb[16].mxu0 }
 0x26a   : > { %v1137_v17 = vpop.f32.mrb[17].mxu0  ;;  %v853_v18 = vsel %vm470_vm1, %v847_v16, -inf }
 0x26b   : > { %854 = vmax.xlane.f32.xlu0 %v853_v18  ;;  %v850_v20 = vpop.f32.mrb[18].mxu0 }
 0x26c   : > { %643 = vrot.lane.b32.xlu1 %v1043_v19, %s1256_s27  ;;  %v1138_v21 = vpop.f32.mrb[19].mxu0 }
 0x270   : > { %863 = vrot.lane.b32.xlu1 %v1043_v19, %s1257_s28 }
 0x273   : > { %v519_v22 = vpop.xlane.xlu0 %518 }
 0x274   : > { %v520_v23 = vsub.f32 %v511_v0, %v519_v22 }
 0x276   : > { %v521_v24 = vmul.f32 1.442695, %v520_v23 }
 0x278   : > { %1212 = vpow2.f32 %v521_v24 }
 0x281   : > { %753 = vrot.lane.b32.xlu0 %v1043_v19, %s1255_s26 }
 0x282   : > { %v1213_v25 = vpop.eup %1212 }
 0x283   : > { %v526_v26 = vpack.c.bf16 %v1213_v25, %v1213_v25  ;;  %v523_v42 = vsel %vm470_vm1, %v1213_v25, 0.0 }
 0x285   : > { %1106 = vmatmul.mubr.msk.bf16.vlgmr.msra.gmra.mrb[4].mxu1 %vm470_vm1, %v526_v26 }
 0x286   : > { %1117 = vmatprep.mubr.msk.bf16.mxu1 %vm1254_vm0, %v1252_v2 }
 0x2e8   : > { %v632_v27 = vpop.xlane.xlu1 %631 }
 0x2e9   : > { %v633_v28 = vsub.f32 %v624_v6, %v632_v27 }
 0x2eb   : > { %v634_v29 = vmul.f32 1.442695, %v633_v28 }
 0x2ec   : > { %v644_v30 = vpop.permute.xlu1 %643 }
 0x2ed   : > { %1214 = vpow2.f32 %v634_v29  ;;  %v649_v31 = vsel %vm530_vm2, %v644_v30, 0 }
 0x2ee   : > { %1116 = vmatpush3.bf16.msra.mxu1 %v649_v31 }
 0x2ef   : > { %1127 = vmatprep.subr.bf16.mxu1 %v1252_v2 }
 0x2f0   : > { %v745_v32 = vpop.xlane.xlu0 %744  ;;  %v864_v45 = vpop.permute.xlu1 %863 }
 0x2f1   : > { %v746_v33 = vsub.f32 %v737_v11, %v745_v32  ;;  %v869_v48 = vsel %vm530_vm2, %v864_v45, 0 }
 0x2f3   : > { %v747_v34 = vmul.f32 1.442695, %v746_v33 }
 0x2f5   : > { %1216 = vpow2.f32 %v747_v34 }
 0x2f7   : > { %v1215_v35 = vpop.eup %1214 }
 0x2f8   : > { %v855_v36 = vpop.xlane.xlu0 %854  ;;  %v636_v37 = vsel %vm470_vm1, %v1215_v35, 0.0  ;;  %v639_v38 = vpack.c.bf16 %v1215_v35, %v1215_v35 }
 0x2f9   : > { %v856_v39 = vsub.f32 %v847_v16, %v855_v36  ;;  %637 = vadd.xlane.f32.xlu1 %v636_v37 }
 0x2fa   : > { %1118 = vmatmul.mubr.msk.bf16.vlgmr.msra.gmra.mrb[8].mxu1 %vm470_vm1, %v639_v38 }
 0x2fb   : > { %v857_v40 = vmul.f32 1.442695, %v856_v39  ;;  %1129 = vmatprep.mubr.msk.bf16.mxu1 %vm1254_vm0, %v1252_v2 }
 0x2fc   : > { %v754_v41 = vpop.permute.xlu0 %753 }
 0x2fd   : > { %1218 = vpow2.f32 %v857_v40  ;;  %v759_v43 = vsel %vm530_vm2, %v754_v41, 0  ;;  %524 = vadd.xlane.f32.xlu1 %v523_v42 }
 0x2fe   : > { %1128 = vmatpush3.bf16.msra.mxu1 %v759_v43 }
 0x2ff   : > { %v1217_v44 = vpop.eup %1216  ;;  %1139 = vmatprep.subr.bf16.mxu1 %v1252_v2 }
 0x300   : > { %v749_v46 = vsel %vm470_vm1, %v1217_v44, 0.0  ;;  %v752_v47 = vpack.c.bf16 %v1217_v44, %v1217_v44 }
 0x301   : > { %750 = vadd.xlane.f32.xlu0 %v749_v46 }
 0x302   : > { %1130 = vmatmul.mubr.msk.bf16.vlgmr.msra.gmra.mrb[12].mxu1 %vm470_vm1, %v752_v47 }
 0x303   : > { %1140 = vmatpush3.bf16.msra.mxu1 %v869_v48  ;;  %1141 = vmatprep.mubr.msk.bf16.mxu1 %vm1254_vm0, %v1252_v2 }
 0x307   : > { %v1219_v49 = vpop.eup %1218 }
 0x308   : > { %v859_v50 = vsel %vm470_vm1, %v1219_v49, 0.0  ;;  %v862_v51 = vpack.c.bf16 %v1219_v49, %v1219_v49 }
 0x309   : > { %860 = vadd.xlane.f32.xlu0 %v859_v50 }
 0x30a   : > { %1142 = vmatmul.mubr.msk.bf16.vlgmr.msra.gmra.mrb[16].mxu1 %vm470_vm1, %v862_v51 }
 0x358   : > { %v568_v52 = vpop.f32.mrb[4].mxu1 }
 0x359   : > { %v1107_v53 = vpop.f32.mrb[5].mxu1 }
 0x35a   : > { %v571_v54 = vpop.f32.mrb[6].mxu1 }
 0x35b   : > { %v1108_v55 = vpop.f32.mrb[7].mxu1 }
 0x386   : > { %v638_v56 = vpop.xlane.xlu1 %637 }
 0x387   : > { %1220 = vrcp.f32 %v638_v56 }
 0x38a   : > { %v525_v13 = vpop.xlane.xlu1 %524 }
 0x38e   : > { %v751_v57 = vpop.xlane.xlu0 %750 }
 0x38f   : > { %1222 = vrcp.f32 %v751_v57 }
 0x391   : > { %v1221_v58 = vpop.eup %1220 }
 0x396   : > { %v861_v62 = vpop.xlane.xlu0 %860 }
 0x397   : > { %1224 = vrcp.f32 %v861_v62 }
 0x398   : > { %1226 = vrcp.f32 %v525_v13 }
 0x399   : > { %v1223_v0 = vpop.eup %1222 }
 0x3a1   : > { %v1225_v7 = vpop.eup %1224 }
 0x3a2   : > { %v1227_v14 = vpop.eup %1226 }
 0x3a3   : > { %v575_v17 = vmul.f32 %v1227_v14, %v568_v52 }
 0x3cd   : > { %v685_v59 = vpop.f32.mrb[8].mxu1 }
 0x3ce   : > { %v692_v60 = vmul.f32 %v1221_v58, %v685_v59  ;;  %v1119_v61 = vpop.f32.mrb[9].mxu1 }
 0x3cf   : > { %v688_v2 = vpop.f32.mrb[10].mxu1 }
 0x3d0   : > { %v1120_v63 = vpop.f32.mrb[11].mxu1  ;;  %914 = vrot.lane.b32.xlu0 %v692_v60, %s1258_s30 }
 0x3d5   : > { %v795_v1 = vpop.f32.mrb[12].mxu1 }
 0x3d6   : > { %v802_v3 = vmul.f32 %v1223_v0, %v795_v1  ;;  %v1131_v4 = vpop.f32.mrb[13].mxu1 }
 0x3d7   : > { %v798_v5 = vpop.f32.mrb[14].mxu1 }
 0x3d8   : > { %v1132_v6 = vpop.f32.mrb[15].mxu1  ;;  %918 = vrot.lane.b32.xlu1 %v802_v3, %s1259_s4 }
 0x3dd   : > { %v905_v8 = vpop.f32.mrb[16].mxu1 }
 0x3de   : > { %v912_v9 = vmul.f32 %v1225_v7, %v905_v8  ;;  %v1143_v10 = vpop.f32.mrb[17].mxu1 }
 0x3df   : > { %v908_v11 = vpop.f32.mrb[18].mxu1 }
 0x3e0   : > { %v1144_v12 = vpop.f32.mrb[19].mxu1  ;;  %922 = vrot.lane.b32.xlu1 %v912_v9, %s1260_s5 }
 0x442   : > { %v915_v15 = vpop.permute.xlu0 %914 }
 0x443   : > { %v925_v18 = vsel %vm470_vm1, %v575_v17, %v915_v15 }
 0x44a   : > { %v919_v16 = vpop.permute.xlu1 %918 }
 0x44b   : > { %v927_v19 = vsel %vm926_vm3, %v925_v18, %v919_v16 }
 0x452   : > { %v923_v20 = vpop.permute.xlu1 %922 }
 0x453   : > { %v929_v21 = vsel %vm928_vm4, %v927_v19, %v923_v20 }
 0x454   : > { %v931_v22 = vsel %vm930_vm5, %v929_v21, 0.0 }
 0x455   : > { %932 = vst [vmem:[%s185_s8] sm:$0xff] %v931_v22 }
 0x456 PF: > { %s13_s14 = sadd.s32 1, %s1250_s14   ;;  %s1475_s12 = smov %s1246_s13 }
 0x457   : > { %p10_p5 = scmp.ge.s32.totalorder %s13_s14, 4   ;;  %s1476_s13 = smov %s1478_s15 }
 0x459   :  { %12 = sbr.rel (!%p10_p5) target bundleno = 2 (0x2), region = 67 }

// kernel: _lambda_.19
= control target key start
LH: loop header
LB: loop body
LE: loop exit
PB: predicated region body
PF: predicated region fallthrough
CT: control target
= control target key end

     0   :  { %v518_v0 = vmov 0.0   ;;  %vm519_vm0 = vmmov 0   ;;  %s683_s1 = inlined_call_operand.vmem [shape: bf16[128,128], index: 1, kind: input, shape index: {}]   ;;  %s684_s3 = inlined_call_operand.vmem [shape: bf16[128,128], index: 3, kind: input, shape index: {}]   ;;  %s685_s0 = inlined_call_operand.vmem [shape: f32[16,128], index: 0, kind: input, shape index: {}]   ;;  %s686_s5 = inlined_call_operand.vmem [shape: bf16[128,128], index: 5, kind: input, shape index: {}]   ;;  %s687_s2 = inlined_call_operand.vmem [shape: f32[1,128], index: 2, kind: input, shape index: {}, may-alias: {2,4,6}]   ;;  %s688_s4 = inlined_call_operand.vmem [shape: f32[1,128], index: 4, kind: input, shape index: {}, may-alias: {2,4,6}]   ;;  %s689_s6 = inlined_call_operand.vmem [shape: f32[1,128], index: 6, kind: input, shape index: {}, may-alias: {2,4,6}]   ;;  %s690_s7 = inlined_call_operand.vmem [shape: f32[16,128], index: 7, kind: output, shape index: {}]  }
   0x1   :  { %432 = vmatprep.subr.bf16.mxu0 %v518_v0  ;;  %v494_v1 = vld [vmem:[%s683_s1] sm:$0xff]   ;;  %448 = vmatprep.mubr.msk.bf16.mxu0 %vm519_vm0, %v518_v0  ;;  %v495_v2 = vld [vmem:[%s683_s1 + $0x8] sm:$0xff]   ;;  %v496_v3 = vld [vmem:[%s683_s1 + $0x10] sm:$0xff]  }
   0x2   :  { %452 = vmatprep.subr.bf16.mxu1 %v518_v0  ;;  %468 = vmatprep.mubr.msk.bf16.mxu1 %vm519_vm0, %v518_v0  ;;  %v502_v4 = vld [vmem:[%s684_s3] sm:$0xff]   ;;  %v497_v5 = vld [vmem:[%s683_s1 + $0x18] sm:$0xff]   ;;  %v503_v6 = vld [vmem:[%s684_s3 + $0x8] sm:$0xff]  }
   0x3   :  { %433 = vmatpush3.bf16.msra.mxu0 %v494_v1  ;;  %453 = vmatpush3.bf16.msra.mxu1 %v502_v4  ;;  %v498_v7 = vld [vmem:[%s683_s1 + $0x20] sm:$0xff]   ;;  %v504_v8 = vld [vmem:[%s684_s3 + $0x10] sm:$0xff]   ;;  %v499_v9 = vld [vmem:[%s683_s1 + $0x28] sm:$0xff]  }
   0x4   :  { %434 = vmatprep.subr.bf16.mxu0 %v518_v0  ;;  %454 = vmatprep.subr.bf16.mxu1 %v518_v0  ;;  %v505_v10 = vld [vmem:[%s684_s3 + $0x18] sm:$0xff]   ;;  %v500_v11 = vld [vmem:[%s683_s1 + $0x30] sm:$0xff]   ;;  %v506_v12 = vld [vmem:[%s684_s3 + $0x20] sm:$0xff]  }
   0x5   :  { %v501_v13 = vld [vmem:[%s683_s1 + $0x38] sm:$0xff]   ;;  %v27_v14 = vld [vmem:[%s685_s0] sm:$0xff]  ;;  %v28_v15 = vld [vmem:[%s685_s0 + $0x8] sm:$0xff] }
   0x6   :  { %v507_v16 = vld [vmem:[%s684_s3 + $0x28] sm:$0xff]   ;;  %v29_v17 = vpack.c.bf16 %v28_v15, %v27_v14  ;;  %v508_v18 = vld [vmem:[%s684_s3 + $0x30] sm:$0xff]   ;;  %v509_v19 = vld [vmem:[%s684_s3 + $0x38] sm:$0xff]  }
   0x7   :  { %435 = vmatpush3.bf16.msra.mxu0 %v495_v2  ;;  %455 = vmatpush3.bf16.msra.mxu1 %v503_v6  ;;  %v510_v20 = vld [vmem:[%s686_s5] sm:$0xff]   ;;  %v511_v21 = vld [vmem:[%s686_s5 + $0x8] sm:$0xff]   ;;  %v512_v22 = vld [vmem:[%s686_s5 + $0x10] sm:$0xff]  }
   0x8   :  { %436 = vmatprep.subr.bf16.mxu0 %v518_v0  ;;  %456 = vmatprep.subr.bf16.mxu1 %v518_v0  ;;  %v513_v23 = vld [vmem:[%s686_s5 + $0x18] sm:$0xff]   ;;  %v514_v24 = vld [vmem:[%s686_s5 + $0x20] sm:$0xff]   ;;  %v515_v25 = vld [vmem:[%s686_s5 + $0x28] sm:$0xff]  }
   0x9   :  { %v378_v26 = vld [vmem:[%s687_s2] ss:$0 sm:$0xff]  ;;  %v516_v36 = vld [vmem:[%s686_s5 + $0x30] sm:$0xff]   ;;  %v517_v37 = vld [vmem:[%s686_s5 + $0x38] sm:$0xff]  }
   0xa   :  { %v387_v38 = vld [vmem:[%s688_s4] ss:$0 sm:$0xff] }
   0xb   :  { %437 = vmatpush3.bf16.msra.mxu0 %v496_v3  ;;  %457 = vmatpush3.bf16.msra.mxu1 %v504_v8  ;;  %v396_v48 = vld [vmem:[%s689_s6] ss:$0 sm:$0xff] }
   0xc   :  { %438 = vmatprep.subr.bf16.mxu0 %v518_v0  ;;  %458 = vmatprep.subr.bf16.mxu1 %v518_v0 }
   0xf   :  { %439 = vmatpush3.bf16.msra.mxu0 %v497_v5  ;;  %459 = vmatpush3.bf16.msra.mxu1 %v505_v10 }
  0x10   :  { %440 = vmatprep.subr.bf16.mxu0 %v518_v0  ;;  %460 = vmatprep.subr.bf16.mxu1 %v518_v0 }
  0x13   :  { %441 = vmatpush3.bf16.msra.mxu0 %v498_v7  ;;  %461 = vmatpush3.bf16.msra.mxu1 %v506_v12 }
  0x14   :  { %442 = vmatprep.subr.bf16.mxu0 %v518_v0  ;;  %462 = vmatprep.subr.bf16.mxu1 %v518_v0 }
  0x17   :  { %443 = vmatpush3.bf16.msra.mxu0 %v499_v9  ;;  %463 = vmatpush3.bf16.msra.mxu1 %v507_v16 }
  0x18   :  { %444 = vmatprep.subr.bf16.mxu0 %v518_v0  ;;  %464 = vmatprep.subr.bf16.mxu1 %v518_v0 }
  0x1b   :  { %445 = vmatpush3.bf16.msra.mxu0 %v500_v11  ;;  %465 = vmatpush3.bf16.msra.mxu1 %v508_v18 }
  0x1c   :  { %446 = vmatprep.subr.bf16.mxu0 %v518_v0  ;;  %466 = vmatprep.subr.bf16.mxu1 %v518_v0 }
  0x1f   :  { %447 = vmatpush3.bf16.msra.mxu0 %v501_v13  ;;  %467 = vmatpush3.bf16.msra.mxu1 %v509_v19 }
  0x20   :  { %472 = vmatprep.subr.bf16.mxu0 %v518_v0 }
  0x22   :  { %449 = vmatmul.mubr.bf16.vlgmr.msra.gmra.mrb[0].mxu0 %v29_v17 }
  0x23   :  { %488 = vmatprep.mubr.msk.bf16.mxu0 %vm519_vm0, %v518_v0  ;;  %473 = vmatpush3.bf16.msra.mxu0 %v510_v20 }
  0x24   :  { %474 = vmatprep.subr.bf16.mxu0 %v518_v0 }
  0x27   :  { %475 = vmatpush3.bf16.msra.mxu0 %v511_v21 }
  0x28   :  { %476 = vmatprep.subr.bf16.mxu0 %v518_v0 }
  0x2b   :  { %477 = vmatpush3.bf16.msra.mxu0 %v512_v22 }
  0x2c   :  { %478 = vmatprep.subr.bf16.mxu0 %v518_v0 }
  0x2f   :  { %479 = vmatpush3.bf16.msra.mxu0 %v513_v23 }
  0x30   :  { %480 = vmatprep.subr.bf16.mxu0 %v518_v0 }
  0x33   :  { %481 = vmatpush3.bf16.msra.mxu0 %v514_v24 }
  0x34   :  { %482 = vmatprep.subr.bf16.mxu0 %v518_v0 }
  0x37   :  { %483 = vmatpush3.bf16.msra.mxu0 %v515_v25 }
  0x38   :  { %484 = vmatprep.subr.bf16.mxu0 %v518_v0 }
  0x3b   :  { %485 = vmatpush3.bf16.msra.mxu0 %v516_v36 }
  0x3c   :  { %486 = vmatprep.subr.bf16.mxu0 %v518_v0 }
  0x3f   :  { %487 = vmatpush3.bf16.msra.mxu0 %v517_v37 }
  0xf5   :  { %v135_v27 = vpop.f32.mrb[0].mxu0 }
  0xf6   :  { %v136_v28 = vadd.f32 %v378_v26, %v135_v27  ;;  %v450_v29 = vpop.f32.mrb[1].mxu0 }
  0xf7   :  { %v138_v30 = vpop.f32.mrb[2].mxu0 }
  0xf8   :  { %v139_v31 = vadd.f32 %v378_v26, %v138_v30  ;;  %v451_v32 = vpop.f32.mrb[3].mxu0  ;;  %v142_v33 = vmax.f32 %v136_v28, 0.0 }
  0xfa   :  { %v143_v34 = vmax.f32 %v139_v31, 0.0 }
  0xfc   :  { %v144_v35 = vpack.c.bf16 %v143_v34, %v142_v33 }
  0xfe   :  { %469 = vmatmul.mubr.bf16.vlgmr.msra.gmra.mrb[0].mxu1 %v144_v35 }
 0x1d1   :  { %v250_v39 = vpop.f32.mrb[0].mxu1 }
 0x1d2   :  { %v251_v40 = vadd.f32 %v387_v38, %v250_v39  ;;  %v470_v41 = vpop.f32.mrb[1].mxu1 }
 0x1d3   :  { %v253_v42 = vpop.f32.mrb[2].mxu1 }
 0x1d4   :  { %v254_v43 = vadd.f32 %v387_v38, %v253_v42  ;;  %v471_v44 = vpop.f32.mrb[3].mxu1  ;;  %v257_v45 = vmax.f32 %v251_v40, 0.0 }
 0x1d6   :  { %v258_v46 = vmax.f32 %v254_v43, 0.0 }
 0x1d8   :  { %v259_v47 = vpack.c.bf16 %v258_v46, %v257_v45 }
 0x1da   :  { %489 = vmatmul.mubr.bf16.vlgmr.msra.gmra.mrb[4].mxu0 %v259_v47 }
 0x2ad   :  { %v365_v49 = vpop.f32.mrb[4].mxu0 }
 0x2ae   :  { %v366_v50 = vadd.f32 %v396_v48, %v365_v49  ;;  %v490_v51 = vpop.f32.mrb[5].mxu0 }
 0x2af   :  { %v368_v52 = vpop.f32.mrb[6].mxu0 }
 0x2b0   :  { %372 = vst [vmem:[%s690_s7] sm:$0xff] %v366_v50  ;;  %v369_v53 = vadd.f32 %v396_v48, %v368_v52  ;;  %v491_v54 = vpop.f32.mrb[7].mxu0 }
 0x2b2   :  { %373 = vst [vmem:[%s690_s7 + $0x8] sm:$0xff] %v369_v53 }

</bundles_post_ra>
